<compile_context>
chip_gen: v7x
topology: tpu7x:2x2x1
jax: 0.10.0
libtpu: 0.0.40
codegen_flags: <defaults>
</compile_context>

<pallas_src>
import functools

import jax
import jax.numpy as jnp
from jax.experimental import pallas as pl
from jax.experimental.pallas import tpu as pltpu

_BN_EPS = 1e-5
_VMEM_LIMIT = 32 * 1024 * 1024       # explicit scoped-VMEM limit (safe v5e..v7x)


def _round_up(x, m):
    return ((x + m - 1) // m) * m


def _choose_row_tile(m, cap=512):
    """Row tile for dense-matmul kernels: multiple of 8; single grid step for
    small m (no forced split on single-TensorCore chips); capped for large m."""
    m8 = _round_up(m, 8)
    return m8 if m8 <= cap else cap


def _choose_row_block(ho, cap=4):
    """Output rows per grid step for the 3x3 conv kernels (must divide Ho)."""
    t = min(cap, ho)
    while ho % t:
        t -= 1
    return t


# ------------------------------ Mish (1 exp) --------------------------------

def _mish(x):
    # mish(x) = x * tanh(softplus(x)) = x * n / (n + 2),  n = e*(e+2), e = exp(x)
    # Single EUP exp; divide via EUP approx reciprocal + one Newton step (VPU).
    e = jnp.exp(jnp.minimum(x, 20.0))
    n = e * (e + 2.0)
    d = n + 2.0
    r = pl.reciprocal(d, approx=True)
    r = r * (2.0 - d * r)                       # Newton refinement
    y = x * n * r
    return jnp.where(x > 20.0, x, y)


# ----------------------------- Pallas kernels --------------------------------

def _mm_bias_mish_kernel(x_ref, w_ref, b_ref, o_ref):
    acc = jnp.dot(x_ref[...], w_ref[...], preferred_element_type=jnp.float32)
    o_ref[...] = _mish(acc + b_ref[...]).astype(o_ref.dtype)


def _conv345_kernel(x_ref, w34_ref, b34_ref, w5_ref, b5_ref,
                    x3_ref, x4_ref, x5_ref):
    # conv3|conv4 in one K=Cin dot; conv5 consumes the x4 half while it is
    # still live in VMEM/vregs.
    a = _mish(jnp.dot(x_ref[...], w34_ref[...],
                      preferred_element_type=jnp.float32) + b34_ref[...])
    c3 = x3_ref.shape[-1]
    x3 = a[:, :c3]
    x4 = a[:, c3:]
    x3_ref[...] = x3.astype(x3_ref.dtype)
    x4_ref[...] = x4.astype(x4_ref.dtype)
    x5_ref[...] = _mish(jnp.dot(x4, w5_ref[...],
                                preferred_element_type=jnp.float32)
                        + b5_ref[...]).astype(x5_ref.dtype)


def _conv78_kernel(x6_ref, x3_ref, w7_ref, b7_ref, w8a_ref, w8b_ref, b8_ref,
                   o_ref):
    # x7 = mish(x6 @ W7 + b7) stays in VMEM; conv8's channel concat is folded
    # into two accumulated matmuls (x7 @ W8a + x3 @ W8b).
    x7 = _mish(jnp.dot(x6_ref[...], w7_ref[...],
                       preferred_element_type=jnp.float32) + b7_ref[...])
    acc = jnp.dot(x7, w8a_ref[...], preferred_element_type=jnp.float32)
    acc = acc + jnp.dot(x3_ref[...], w8b_ref[...],
                        preferred_element_type=jnp.float32)
    o_ref[...] = _mish(acc + b8_ref[...]).astype(o_ref.dtype)


def _c3s2_kernel(*refs, th, wo):
    # 3x3 stride-2 conv, th output rows per step.
    # refs: 2*th+1 tap refs (1,1,Wo+1,2*Cin), w01 (3,2Cin,Cout), w2 (3,2Cin,Cout),
    #       bias (1,Cout), out (1,th,Wo,Cout).
    taps = refs[:2 * th + 1]
    w01_ref, w2_ref, b_ref, o_ref = refs[2 * th + 1:]
    b = b_ref[...]
    for row in range(th):
        acc = None
        for di in range(3):
            t = taps[2 * row + di]
            # taps (di,0)+(di,1) share one K=2*Cin dot; (di,2) uses the
            # row-shifted window with a zero-padded second weight half.
            a = jnp.dot(t[0, 0, 0:wo, :], w01_ref[di],
                        preferred_element_type=jnp.float32)
            a = a + jnp.dot(t[0, 0, 1:wo + 1, :], w2_ref[di],
                            preferred_element_type=jnp.float32)
            acc = a if acc is None else acc + a
        o_ref[0, row] = _mish(acc + b).astype(o_ref.dtype)


def _c3s1_res_kernel(*refs, th, wo):
    # 3x3 stride-1 conv + post-mish residual, th output rows per step.
    # refs: th+2 tap refs (1,1,W+2,Cin), w (3,3,Cin,Cout), bias (1,Cout),
    #       residual (1,th,Wo,Cout), out (1,th,Wo,Cout).
    taps = refs[:th + 2]
    w_ref, b_ref, res_ref, o_ref = refs[th + 2:]
    b = b_ref[...]
    for row in range(th):
        acc = None
        for di in range(3):
            t = taps[row + di]
            for dj in range(3):
                a = jnp.dot(t[0, 0, dj:dj + wo, :], w_ref[di, dj],
                            preferred_element_type=jnp.float32)
                acc = a if acc is None else acc + a
        o_ref[0, row] = (_mish(acc + b) + res_ref[0, row]).astype(o_ref.dtype)


# ------------------------------ JAX glue --------------------------------------

def _fold_bn(params):
    """Fold eval-mode BatchNorm into the conv: returns (HWIO weight, bias)."""
    scale = params["gamma"] / jnp.sqrt(params["var"] + _BN_EPS)
    w = jnp.transpose(params["w"], (2, 3, 1, 0)) * scale     # (kh, kw, Cin, Cout)
    b = params["beta"] - params["mean"] * scale
    return w, b


def _mm_bias_mish(x2d, w_mat, bias):
    """mish(x2d @ w_mat + bias), row-tiled single pallas_call."""
    m, kd = x2d.shape
    cout = w_mat.shape[1]
    tm = _choose_row_tile(m)
    grid_m = pl.cdiv(m, tm)
    mp = grid_m * tm
    if mp != m:
        x2d = jnp.pad(x2d, ((0, mp - m), (0, 0)))
    out = pl.pallas_call(
        _mm_bias_mish_kernel,
        out_shape=jax.ShapeDtypeStruct((mp, cout), jnp.float32),
        grid=(grid_m,),
        in_specs=[
            pl.BlockSpec((tm, kd), lambda i: (i, 0)),
            pl.BlockSpec((kd, cout), lambda i: (0, 0)),
            pl.BlockSpec((1, cout), lambda i: (0, 0)),
        ],
        out_specs=pl.BlockSpec((tm, cout), lambda i: (i, 0)),
        compiler_params=pltpu.CompilerParams(
            dimension_semantics=("parallel",),
            vmem_limit_bytes=_VMEM_LIMIT),
        cost_estimate=pl.CostEstimate(
            flops=2 * m * kd * cout,
            transcendentals=m * cout,
            bytes_accessed=4 * (m * kd + kd * cout + m * cout)),
    )(x2d, w_mat, bias.reshape(1, cout))
    return out[:m]


def conv1_3x3_s1(x_nhwc, p):
    """conv1 (Cin=3): full-tap patches (K=27, zero-padded to 32) + one
    row-tiled K=32 MXU dot per tile (no 9-wide lane layout, VMEM-bounded)."""
    n, h, w, cin = x_nhwc.shape
    wm, b = _fold_bn(p)                              # (3, 3, Cin, Cout)
    cout = wm.shape[-1]
    xp = jnp.pad(x_nhwc, ((0, 0), (1, 1), (1, 1), (0, 0)))
    cols = jnp.concatenate(
        [xp[:, di:di + h, dj:dj + w, :] for di in range(3) for dj in range(3)],
        axis=-1)                                      # (N, H, W, 9*Cin)
    patches = cols.reshape(n * h * w, 9 * cin)
    w_mat = wm.reshape(9 * cin, cout)
    kd8 = _round_up(9 * cin, 8)
    if kd8 != 9 * cin:
        patches = jnp.pad(patches, ((0, 0), (0, kd8 - 9 * cin)))
        w_mat = jnp.pad(w_mat, ((0, kd8 - 9 * cin), (0, 0)))
    out = _mm_bias_mish(patches, w_mat, b)
    return out.reshape(n, h, w, cout)


def conv2_3x3_s2(x_nhwc, p):
    """conv2 (3x3 / stride-2) without HBM im2col: padded plane reshaped so
    width-pairs sit on lanes; overlapping BlockSpec windows supply the
    padded rows; 6 accumulated K=2*Cin dots per output row in-kernel."""
    n, h, w, cin = x_nhwc.shape
    assert h % 2 == 0 and w % 2 == 0
    ho, wo = h // 2, w // 2
    wm, b = _fold_bn(p)                               # (3, 3, Cin, Cout)
    cout = wm.shape[-1]
    w01 = jnp.concatenate([wm[:, 0], wm[:, 1]], axis=1)            # (3,2Cin,Cout)
    w2 = jnp.concatenate([wm[:, 2], jnp.zeros_like(wm[:, 2])], axis=1)

    xp = jnp.pad(x_nhwc, ((0, 0), (1, 1), (1, 1), (0, 0)))         # (N,H+2,W+2,C)
    xq = xp.reshape(n, h + 2, (w + 2) // 2, 2 * cin)               # pairs on lanes

    th = _choose_row_block(ho)
    n_taps = 2 * th + 1
    tap_specs = [
        pl.BlockSpec((1, 1, (w + 2) // 2, 2 * cin),
                     lambda bi, ti, k=k: (bi, 2 * th * ti + k, 0, 0))
        for k in range(n_taps)]
    m = n * ho * wo
    out = pl.pallas_call(
        functools.partial(_c3s2_kernel, th=th, wo=wo),
        out_shape=jax.ShapeDtypeStruct((n, ho, wo, cout), jnp.float32),
        grid=(n, ho // th),
        in_specs=tap_specs + [
            pl.BlockSpec((3, 2 * cin, cout), lambda bi, ti: (0, 0, 0)),
            pl.BlockSpec((3, 2 * cin, cout), lambda bi, ti: (0, 0, 0)),
            pl.BlockSpec((1, cout), lambda bi, ti: (0, 0)),
        ],
        out_specs=pl.BlockSpec((1, th, wo, cout),
                               lambda bi, ti: (bi, ti, 0, 0)),
        compiler_params=pltpu.CompilerParams(
            dimension_semantics=("parallel", "parallel"),
            vmem_limit_bytes=_VMEM_LIMIT),
        cost_estimate=pl.CostEstimate(
            flops=2 * m * 9 * cin * cout,
            transcendentals=m * cout,
            bytes_accessed=4 * (2 * n * (h + 2) * (w + 2) * cin
                                + 12 * cin * cout + m * cout)),
    )(*([xq] * n_taps), w01, w2, b.reshape(1, cout))
    return out


def conv6_3x3_s1_res(x_nhwc, p, residual_nhwc):
    """conv6 (3x3 / stride-1) + residual without any HBM im2col: only jnp.pad
    touches HBM; 9 taps accumulated in-kernel from overlapping per-padded-row
    BlockSpec windows; grid row-tiles Ho (VMEM-bounded, both v7x TCs busy)."""
    n, h, w, cin = x_nhwc.shape
    ho, wo = h, w
    wm, b = _fold_bn(p)                               # (3, 3, Cin, Cout)
    cout = wm.shape[-1]
    xp = jnp.pad(x_nhwc, ((0, 0), (1, 1), (1, 1), (0, 0)))        # (N,H+2,W+2,C)

    th = _choose_row_block(ho)
    n_taps = th + 2
    tap_specs = [
        pl.BlockSpec((1, 1, w + 2, cin),
                     lambda bi, ti, k=k: (bi, th * ti + k, 0, 0))
        for k in range(n_taps)]
    m = n * ho * wo
    out = pl.pallas_call(
        functools.partial(_c3s1_res_kernel, th=th, wo=wo),
        out_shape=jax.ShapeDtypeStruct((n, ho, wo, cout), jnp.float32),
        grid=(n, ho // th),
        in_specs=tap_specs + [
            pl.BlockSpec((3, 3, cin, cout), lambda bi, ti: (0, 0, 0, 0)),
            pl.BlockSpec((1, cout), lambda bi, ti: (0, 0)),
            pl.BlockSpec((1, th, wo, cout), lambda bi, ti: (bi, ti, 0, 0)),
        ],
        out_specs=pl.BlockSpec((1, th, wo, cout),
                               lambda bi, ti: (bi, ti, 0, 0)),
        compiler_params=pltpu.CompilerParams(
            dimension_semantics=("parallel", "parallel"),
            vmem_limit_bytes=_VMEM_LIMIT),
        cost_estimate=pl.CostEstimate(
            flops=2 * m * 9 * cin * cout,
            transcendentals=m * cout,
            bytes_accessed=4 * (3 * n * (h + 2) * (w + 2) * cin
                                + 9 * cin * cout + 2 * m * cout)),
    )(*([xp] * n_taps), wm, b.reshape(1, cout), residual_nhwc)
    return out


def conv3_4_5(x_nhwc, p3, p4, p5):
    """conv3|conv4 fused along Cout into one dot, conv5 fused into the same
    kernel (x4 never re-reads HBM before conv5); three outputs."""
    n, h, w, cin = x_nhwc.shape
    w3, b3 = _fold_bn(p3)
    w4, b4 = _fold_bn(p4)
    w5, b5 = _fold_bn(p5)
    c3, c4, c5 = w3.shape[-1], w4.shape[-1], w5.shape[-1]
    w34 = jnp.concatenate([w3.reshape(cin, c3), w4.reshape(cin, c4)], axis=1)
    b34 = jnp.concatenate([b3, b4])
    w5m = w5.reshape(c4, c5)

    x2d = x_nhwc.reshape(n * h * w, cin)
    m = x2d.shape[0]
    tm = _choose_row_tile(m)
    grid_m = pl.cdiv(m, tm)
    mp = grid_m * tm
    if mp != m:
        x2d = jnp.pad(x2d, ((0, mp - m), (0, 0)))

    x3, x4, x5 = pl.pallas_call(
        _conv345_kernel,
        out_shape=(jax.ShapeDtypeStruct((mp, c3), jnp.float32),
                   jax.ShapeDtypeStruct((mp, c4), jnp.float32),
                   jax.ShapeDtypeStruct((mp, c5), jnp.float32)),
        grid=(grid_m,),
        in_specs=[
            pl.BlockSpec((tm, cin), lambda i: (i, 0)),
            pl.BlockSpec((cin, c3 + c4), lambda i: (0, 0)),
            pl.BlockSpec((1, c3 + c4), lambda i: (0, 0)),
            pl.BlockSpec((c4, c5), lambda i: (0, 0)),
            pl.BlockSpec((1, c5), lambda i: (0, 0)),
        ],
        out_specs=(pl.BlockSpec((tm, c3), lambda i: (i, 0)),
                   pl.BlockSpec((tm, c4), lambda i: (i, 0)),
                   pl.BlockSpec((tm, c5), lambda i: (i, 0))),
        compiler_params=pltpu.CompilerParams(
            dimension_semantics=("parallel",),
            vmem_limit_bytes=_VMEM_LIMIT),
        cost_estimate=pl.CostEstimate(
            flops=2 * m * (cin * (c3 + c4) + c4 * c5),
            transcendentals=m * (c3 + c4 + c5),
            bytes_accessed=4 * (m * (cin + c3 + c4 + c5)
                                + cin * (c3 + c4) + c4 * c5)),
    )(x2d, w34, b34.reshape(1, c3 + c4), w5m, b5.reshape(1, c5))
    return (x3[:m].reshape(n, h, w, c3),
            x4[:m].reshape(n, h, w, c4),
            x5[:m].reshape(n, h, w, c5))


def conv7_conv8(x6_nhwc, x3_nhwc, p7, p8):
    """x8 = conv8(cat([conv7(x6), x3])) fused in one kernel."""
    n, h, w, c6 = x6_nhwc.shape
    c3 = x3_nhwc.shape[-1]
    w7, b7 = _fold_bn(p7)
    w8, b8 = _fold_bn(p8)
    c7 = w7.shape[-1]
    cout = w8.shape[-1]
    w7m = w7.reshape(c6, c7)
    w8m = w8.reshape(-1, cout)                        # rows ordered [x7 ch | x3 ch]
    w8a, w8b = w8m[:c7], w8m[c7:]

    x6 = x6_nhwc.reshape(n * h * w, c6)
    x3 = x3_nhwc.reshape(n * h * w, c3)
    m = x6.shape[0]
    tm = _choose_row_tile(m, cap=256)                 # cap protects x7+acc vregs
    grid_m = pl.cdiv(m, tm)
    mp = grid_m * tm
    if mp != m:
        x6 = jnp.pad(x6, ((0, mp - m), (0, 0)))
        x3 = jnp.pad(x3, ((0, mp - m), (0, 0)))

    out = pl.pallas_call(
        _conv78_kernel,
        out_shape=jax.ShapeDtypeStruct((mp, cout), jnp.float32),
        grid=(grid_m,),
        in_specs=[
            pl.BlockSpec((tm, c6), lambda i: (i, 0)),
            pl.BlockSpec((tm, c3), lambda i: (i, 0)),
            pl.BlockSpec((c6, c7), lambda i: (0, 0)),
            pl.BlockSpec((1, c7), lambda i: (0, 0)),
            pl.BlockSpec((c7, cout), lambda i: (0, 0)),
            pl.BlockSpec((c3, cout), lambda i: (0, 0)),
            pl.BlockSpec((1, cout), lambda i: (0, 0)),
        ],
        out_specs=pl.BlockSpec((tm, cout), lambda i: (i, 0)),
        compiler_params=pltpu.CompilerParams(
            dimension_semantics=("parallel",),
            vmem_limit_bytes=_VMEM_LIMIT),
        cost_estimate=pl.CostEstimate(
            flops=2 * m * (c6 * c7 + c7 * cout + c3 * cout),
            transcendentals=m * (c7 + cout),
            bytes_accessed=4 * (m * (c6 + c3 + cout)
                                + c6 * c7 + c7 * cout + c3 * cout)),
    )(x6, x3, w7m, b7.reshape(1, c7), w8a, w8b, b8.reshape(1, cout))
    return out[:m].reshape(n, h, w, cout)


# --------------------------- Parameter construction ---------------------------

def make_cba_params(key, cin, cout, k, stride):
    kw_, kg, kb, km, kv = jax.random.split(key, 5)
    return dict(
        w=0.1 * jax.random.normal(kw_, (cout, cin, k, k), jnp.float32),
        gamma=1.0 + 0.1 * jax.random.normal(kg, (cout,), jnp.float32),
        beta=0.1 * jax.random.normal(kb, (cout,), jnp.float32),
        mean=0.1 * jax.random.normal(km, (cout,), jnp.float32),
        var=jnp.abs(jax.random.normal(kv, (cout,), jnp.float32)) + 0.5,
        k=k, stride=stride,
    )


def make_downsample1_params(key):
    cfg = {
        "conv1": (3, 32, 3, 1), "conv2": (32, 64, 3, 2), "conv3": (64, 64, 1, 1),
        "conv4": (64, 64, 1, 1), "conv5": (64, 32, 1, 1), "conv6": (32, 64, 3, 1),
        "conv7": (64, 64, 1, 1), "conv8": (128, 64, 1, 1),
    }
    keys = jax.random.split(key, len(cfg))
    return {name: make_cba_params(k, *c) for k, (name, c) in zip(keys, cfg.items())}


# ------------------------------ Forward pass ----------------------------------

def downsample1(x_nchw, params):
    x = jnp.transpose(x_nchw, (0, 2, 3, 1))                      # NCHW -> NHWC
    x1 = conv1_3x3_s1(x, params["conv1"])
    x2 = conv2_3x3_s2(x1, params["conv2"])
    x3, x4, x5 = conv3_4_5(x2, params["conv3"], params["conv4"], params["conv5"])
    x6 = conv6_3x3_s1_res(x5, params["conv6"], residual_nhwc=x4)  # conv6(x5) + x4
    x8 = conv7_conv8(x6, x3, params["conv7"], params["conv8"])
    return jnp.transpose(x8, (0, 3, 1, 2))                       # NHWC -> NCHW


# ------------------------------ Pure-JAX reference -----------------------------

def _ref_cba(x_nhwc, p, residual=None):
    w = jnp.transpose(p["w"], (2, 3, 1, 0))                      # HWIO
    pad = (p["k"] - 1) // 2
    y = jax.lax.conv_general_dilated(
        x_nhwc, w, (p["stride"], p["stride"]), [(pad, pad), (pad, pad)],
        dimension_numbers=("NHWC", "HWIO", "NHWC"))
    y = (y - p["mean"]) / jnp.sqrt(p["var"] + _BN_EPS) * p["gamma"] + p["beta"]
    y = y * jnp.tanh(jax.nn.softplus(y))
    return y if residual is None else y + residual


def _ref_downsample1(x_nchw, params):
    x = jnp.transpose(x_nchw, (0, 2, 3, 1))
    x1 = _ref_cba(x, params["conv1"])
    x2 = _ref_cba(x1, params["conv2"])
    x3 = _ref_cba(x2, params["conv3"])
    x4 = _ref_cba(x2, params["conv4"])
    x5 = _ref_cba(x4, params["conv5"])
    x6 = _ref_cba(x5, params["conv6"], residual=x4)
    x7 = _ref_cba(x6, params["conv7"])
    x7 = jnp.concatenate([x7, x3], axis=-1)
    x8 = _ref_cba(x7, params["conv8"])
    return jnp.transpose(x8, (0, 3, 1, 2))


if __name__ == "__main__":
    key = jax.random.PRNGKey(0)
    kx, kp = jax.random.split(key)
    x = jax.random.normal(kx, (2, 3, 16, 16), jnp.float32)       # NCHW, Cin=3
    params = make_downsample1_params(kp)

    out = jax.block_until_ready(downsample1(x, params))
    assert out.shape == (2, 64, 8, 8), out.shape

    ref = jax.block_until_ready(_ref_downsample1(x, params))
    assert jnp.allclose(out, ref, atol=1e-3, rtol=1e-3), \
        float(jnp.max(jnp.abs(out - ref)))

    print("KERNEL_OK")
</pallas_src>

<mosaic_0001>
module attributes {stable_mosaic.version = 11 : i64} {
  func.func @_mm_bias_mish_kernel(%arg0: i32, %arg1: memref<512x32xf32, #tpu.memory_space<vmem>>, %arg2: memref<32x32xf32, #tpu.memory_space<vmem>>, %arg3: memref<1x32xf32, #tpu.memory_space<vmem>>, %arg4: memref<512x32xf32, #tpu.memory_space<vmem>>) attributes {dimension_semantics = [#tpu.dimension_semantics<parallel>], iteration_bounds = array<i64: 1>, scalar_prefetch = 0 : i64, scratch_operands = 0 : i64, tpu.core_type = #tpu.core_type<tc>, window_params = [{transform_indices = @transform_0, window_bounds = array<i64: 512, 32>}, {pipeline_mode = #tpu.pipeline_mode<synchronous>, transform_indices = @transform_1, window_bounds = array<i64: 32, 32>}, {pipeline_mode = #tpu.pipeline_mode<synchronous>, transform_indices = @transform_2, window_bounds = array<i64: 1, 32>}, {transform_indices = @transform_3, window_bounds = array<i64: 512, 32>}]} {
    %c0 = arith.constant 0 : index
    %c0_0 = arith.constant 0 : index
    %0 = vector.load %arg1[%c0, %c0_0] : memref<512x32xf32, #tpu.memory_space<vmem>>, vector<512x32xf32>
    %c0_1 = arith.constant 0 : index
    %c0_2 = arith.constant 0 : index
    %1 = vector.load %arg2[%c0_1, %c0_2] : memref<32x32xf32, #tpu.memory_space<vmem>>, vector<32x32xf32>
    %cst = arith.constant dense<0.000000e+00> : vector<512x32xf32>
    %2 = tpu.matmul %0, %1, %cst {dimension_numbers = #tpu.dot_dimension_numbers<[1], [0], [0], [1], [0, 0, 1, 1], [], []>} : vector<512x32xf32>, vector<32x32xf32>, vector<512x32xf32> -> vector<512x32xf32>
    %c0_3 = arith.constant 0 : index
    %c0_4 = arith.constant 0 : index
    %3 = vector.load %arg3[%c0_3, %c0_4] : memref<1x32xf32, #tpu.memory_space<vmem>>, vector<1x32xf32>
    %4 = vector.broadcast %3 : vector<1x32xf32> to vector<512x32xf32>
    %5 = arith.addf %2, %4 : vector<512x32xf32>
    %cst_5 = arith.constant 2.000000e+01 : f32
    %6 = vector.broadcast %cst_5 : f32 to vector<512x32xf32>
    %7 = arith.minimumf %5, %6 : vector<512x32xf32>
    %8 = math.exp %7 : vector<512x32xf32>
    %cst_6 = arith.constant 2.000000e+00 : f32
    %9 = vector.broadcast %cst_6 : f32 to vector<512x32xf32>
    %10 = arith.addf %8, %9 : vector<512x32xf32>
    %11 = arith.mulf %8, %10 : vector<512x32xf32>
    %cst_7 = arith.constant 2.000000e+00 : f32
    %12 = vector.broadcast %cst_7 : f32 to vector<512x32xf32>
    %13 = arith.addf %11, %12 : vector<512x32xf32>
    %14 = tpu.reciprocal %13 {approx = true} : vector<512x32xf32> -> vector<512x32xf32>
    %15 = arith.mulf %13, %14 : vector<512x32xf32>
    %cst_8 = arith.constant 2.000000e+00 : f32
    %16 = vector.broadcast %cst_8 : f32 to vector<512x32xf32>
    %17 = arith.subf %16, %15 : vector<512x32xf32>
    %18 = arith.mulf %14, %17 : vector<512x32xf32>
    %19 = arith.mulf %5, %11 : vector<512x32xf32>
    %20 = arith.mulf %19, %18 : vector<512x32xf32>
    %cst_9 = arith.constant 2.000000e+01 : f32
    %21 = vector.broadcast %cst_9 : f32 to vector<512x32xf32>
    %22 = arith.cmpf ogt, %5, %21 : vector<512x32xf32>
    %23 = arith.select %22, %5, %20 : vector<512x32xi1>, vector<512x32xf32>
    %c0_10 = arith.constant 0 : index
    %c0_11 = arith.constant 0 : index
    %24 = vector.load %arg4[%c0_10, %c0_11] : memref<512x32xf32, #tpu.memory_space<vmem>>, vector<512x32xf32>
    tpu.vector_store %arg4[%c0_10, %c0_11], %23 {strides = array<i32>} : memref<512x32xf32, #tpu.memory_space<vmem>>, vector<512x32xf32>,
    return
  }
  func.func @transform_0(%arg0: i32) -> (i32, i32) {
    %c0_i32 = arith.constant 0 : i32
    %c0_i32_0 = arith.constant 0 : i32
    return %arg0, %c0_i32 : i32, i32
  }
  func.func @transform_1(%arg0: i32) -> (i32, i32) {
    %c0_i32 = arith.constant 0 : i32
    %c0_i32_0 = arith.constant 0 : i32
    %c0_i32_1 = arith.constant 0 : i32
    return %c0_i32, %c0_i32_0 : i32, i32
  }
  func.func @transform_2(%arg0: i32) -> (i32, i32) {
    %c0_i32 = arith.constant 0 : i32
    %c0_i32_0 = arith.constant 0 : i32
    %c0_i32_1 = arith.constant 0 : i32
    return %c0_i32, %c0_i32_0 : i32, i32
  }
  func.func @transform_3(%arg0: i32) -> (i32, i32) {
    %c0_i32 = arith.constant 0 : i32
    %c0_i32_0 = arith.constant 0 : i32
    return %arg0, %c0_i32 : i32, i32
  }
}

</mosaic_0001>

<bundles_post_ra>
// kernel: tpu_custom_call.1
= control target key start
LH: loop header
LB: loop body
LE: loop exit
PB: predicated region body
PF: predicated region fallthrough
CT: control target
= control target key end

     0   :  { %vm89_vm0 = vcmask 261120   ;;  %s3729_s1 = inlined_call_operand.vmem [shape: f32[32,32], index: 1, kind: input, shape index: {}]   ;;  %s3730_s0 = inlined_call_operand.vmem [shape: f32[512,32], index: 0, kind: input, shape index: {}]   ;;  %s3731_s2 = inlined_call_operand.vmem [shape: f32[1,32], index: 2, kind: input, shape index: {}]   ;;  %s3732_s3 = inlined_call_operand.vmem [shape: f32[512,32], index: 3, kind: output, shape index: {}]  }
   0x1   :  { %v78_v0 = vld [vmem:[%s3729_s1] sm:$0xff]  ;;  %v79_v1 = vld [vmem:[%s3729_s1 + $0x8] sm:$0xff]  ;;  %v80_v2 = vld [vmem:[%s3729_s1 + $0x10] sm:$0xff] }
   0x2   :  { %v1868_v3 = vpack.c.bf16 %v79_v1, %v78_v0  ;;  %v81_v4 = vld [vmem:[%s3729_s1 + $0x18] sm:$0xff]  ;;  %v14_v5 = vld [vmem:[%s3730_s0] sm:$0xff]  ;;  %v15_v8 = vld [vmem:[%s3730_s0 + $0x8] sm:$0xff] }
   0x3   :  { %v46_v6 = vld [vmem:[%s3730_s0 + $0x100] sm:$0xff]  ;;  %v1872_v7 = vpack.c.bf16 %v81_v4, %v80_v2  ;;  %1772 = vmatprep.mubr.msk.f32.mxu0 %vm89_vm0, %v14_v5  ;;  %v47_v9 = vld [vmem:[%s3730_s0 + $0x108] sm:$0xff]  ;;  %v16_v10 = vld [vmem:[%s3730_s0 + $0x10] sm:$0xff] }
   0x4   :  { %1820 = vmatprep.mubr.msk.f32.mxu1 %vm89_vm0, %v46_v6  ;;  %1869 = vmatprep.subr.bf16.mxu0 %v1868_v3  ;;  %v48_v11 = vld [vmem:[%s3730_s0 + $0x110] sm:$0xff]  ;;  %v17_v12 = vld [vmem:[%s3730_s0 + $0x18] sm:$0xff]  ;;  %v18_v14 = vld [vmem:[%s3730_s0 + $0x20] sm:$0xff] }
   0x5   :  { %1876 = vmatprep.subr.bf16.mxu1 %v1868_v3  ;;  %1871 = vmatpush3.bf16.msra.mxu0 %v1868_v3  ;;  %v49_v13 = vld [vmem:[%s3730_s0 + $0x118] sm:$0xff]  ;;  %v50_v15 = vld [vmem:[%s3730_s0 + $0x120] sm:$0xff]  ;;  %v19_v16 = vld [vmem:[%s3730_s0 + $0x28] sm:$0xff] }
   0x6   :  { %1878 = vmatpush3.bf16.msra.mxu1 %v1868_v3  ;;  %1873 = vmatprep.subr.bf16.mxu0 %v1872_v7  ;;  %v51_v17 = vld [vmem:[%s3730_s0 + $0x128] sm:$0xff]  ;;  %v20_v18 = vld [vmem:[%s3730_s0 + $0x30] sm:$0xff]  ;;  %v21_v20 = vld [vmem:[%s3730_s0 + $0x38] sm:$0xff] }
   0x7   :  { %1877 = vmatprep.subr.bf16.mxu1 %v1872_v7  ;;  %v52_v19 = vld [vmem:[%s3730_s0 + $0x130] sm:$0xff]  ;;  %v53_v21 = vld [vmem:[%s3730_s0 + $0x138] sm:$0xff]  ;;  %v22_v22 = vld [vmem:[%s3730_s0 + $0x40] sm:$0xff] }
   0x8   :  { %v54_v23 = vld [vmem:[%s3730_s0 + $0x140] sm:$0xff]  ;;  %v23_v24 = vld [vmem:[%s3730_s0 + $0x48] sm:$0xff]  ;;  %v24_v26 = vld [vmem:[%s3730_s0 + $0x50] sm:$0xff] }
   0x9   :  { %1875 = vmatpush3.bf16.msra.mxu0 %v1872_v7  ;;  %v55_v25 = vld [vmem:[%s3730_s0 + $0x148] sm:$0xff]  ;;  %v56_v27 = vld [vmem:[%s3730_s0 + $0x150] sm:$0xff]  ;;  %v25_v28 = vld [vmem:[%s3730_s0 + $0x58] sm:$0xff] }
   0xa   :  { %1879 = vmatpush3.bf16.msra.mxu1 %v1872_v7  ;;  %v57_v29 = vld [vmem:[%s3730_s0 + $0x158] sm:$0xff]  ;;  %v26_v30 = vld [vmem:[%s3730_s0 + $0x60] sm:$0xff]  ;;  %v27_v32 = vld [vmem:[%s3730_s0 + $0x68] sm:$0xff] }
   0xb   :  { %v58_v31 = vld [vmem:[%s3730_s0 + $0x160] sm:$0xff]  ;;  %v59_v33 = vld [vmem:[%s3730_s0 + $0x168] sm:$0xff]  ;;  %v28_v34 = vld [vmem:[%s3730_s0 + $0x70] sm:$0xff] }
   0xc   :  { %1773 = vmatmul.mubr.msk.f32.vlgmr.msra.gmra.mrb[0].mxu0 %vm89_vm0, %v15_v8  ;;  %v60_v35 = vld [vmem:[%s3730_s0 + $0x170] sm:$0xff]  ;;  %v29_v36 = vld [vmem:[%s3730_s0 + $0x78] sm:$0xff]  ;;  %v30_v38 = vld [vmem:[%s3730_s0 + $0x80] sm:$0xff] }
   0xd   :  { %1821 = vmatmul.mubr.msk.f32.vlgmr.msra.gmra.mrb[0].mxu1 %vm89_vm0, %v47_v9  ;;  %1775 = vmatprep.mubr.msk.f32.mxu0 %vm89_vm0, %v16_v10  ;;  %v61_v37 = vld [vmem:[%s3730_s0 + $0x178] sm:$0xff]  ;;  %v62_v39 = vld [vmem:[%s3730_s0 + $0x180] sm:$0xff]  ;;  %v31_v40 = vld [vmem:[%s3730_s0 + $0x88] sm:$0xff] }
   0xe   :  { %1823 = vmatprep.mubr.msk.f32.mxu1 %vm89_vm0, %v48_v11  ;;  %v63_v41 = vld [vmem:[%s3730_s0 + $0x188] sm:$0xff]  ;;  %v32_v42 = vld [vmem:[%s3730_s0 + $0x90] sm:$0xff]  ;;  %v33_v44 = vld [vmem:[%s3730_s0 + $0x98] sm:$0xff] }
   0xf   :  { %v64_v43 = vld [vmem:[%s3730_s0 + $0x190] sm:$0xff]  ;;  %v65_v45 = vld [vmem:[%s3730_s0 + $0x198] sm:$0xff]  ;;  %v34_v46 = vld [vmem:[%s3730_s0 + $0xa0] sm:$0xff] }
  0x10   :  { %1776 = vmatmul.mubr.msk.f32.gmra.mrb[2].mxu0 %vm89_vm0, %v17_v12  ;;  %v66_v47 = vld [vmem:[%s3730_s0 + $0x1a0] sm:$0xff]  ;;  %v35_v48 = vld [vmem:[%s3730_s0 + $0xa8] sm:$0xff]  ;;  %v36_v50 = vld [vmem:[%s3730_s0 + $0xb0] sm:$0xff] }
  0x11   :  { %1824 = vmatmul.mubr.msk.f32.gmra.mrb[2].mxu1 %vm89_vm0, %v49_v13  ;;  %1778 = vmatprep.mubr.msk.f32.mxu0 %vm89_vm0, %v18_v14  ;;  %v67_v49 = vld [vmem:[%s3730_s0 + $0x1a8] sm:$0xff]  ;;  %v68_v51 = vld [vmem:[%s3730_s0 + $0x1b0] sm:$0xff]  ;;  %v37_v52 = vld [vmem:[%s3730_s0 + $0xb8] sm:$0xff] }
  0x12   :  { %1826 = vmatprep.mubr.msk.f32.mxu1 %vm89_vm0, %v50_v15  ;;  %v69_v53 = vld [vmem:[%s3730_s0 + $0x1b8] sm:$0xff]  ;;  %v38_v54 = vld [vmem:[%s3730_s0 + $0xc0] sm:$0xff]  ;;  %v39_v56 = vld [vmem:[%s3730_s0 + $0xc8] sm:$0xff] }
  0x13   :  { %v70_v55 = vld [vmem:[%s3730_s0 + $0x1c0] sm:$0xff]  ;;  %v71_v57 = vld [vmem:[%s3730_s0 + $0x1c8] sm:$0xff]  ;;  %v40_v58 = vld [vmem:[%s3730_s0 + $0xd0] sm:$0xff] }
  0x14   :  { %1779 = vmatmul.mubr.msk.f32.gmra.mrb[4].mxu0 %vm89_vm0, %v19_v16  ;;  %v72_v59 = vld [vmem:[%s3730_s0 + $0x1d0] sm:$0xff]  ;;  %v41_v60 = vld [vmem:[%s3730_s0 + $0xd8] sm:$0xff]  ;;  %v42_v62 = vld [vmem:[%s3730_s0 + $0xe0] sm:$0xff] }
  0x15   :  { %1827 = vmatmul.mubr.msk.f32.gmra.mrb[4].mxu1 %vm89_vm0, %v51_v17  ;;  %1781 = vmatprep.mubr.msk.f32.mxu0 %vm89_vm0, %v20_v18  ;;  %v73_v61 = vld [vmem:[%s3730_s0 + $0x1d8] sm:$0xff]  ;;  %v74_v63 = vld [vmem:[%s3730_s0 + $0x1e0] sm:$0xff]  ;;  %v43_v0 = vld [vmem:[%s3730_s0 + $0xe8] sm:$0xff] }
  0x16   :  { %1829 = vmatprep.mubr.msk.f32.mxu1 %vm89_vm0, %v52_v19  ;;  %v75_v1 = vld [vmem:[%s3730_s0 + $0x1e8] sm:$0xff]  ;;  %v44_v2 = vld [vmem:[%s3730_s0 + $0xf0] sm:$0xff]  ;;  %v45_v4 = vld [vmem:[%s3730_s0 + $0xf8] sm:$0xff] }
  0x17   :  { %v76_v3 = vld [vmem:[%s3730_s0 + $0x1f0] sm:$0xff]  ;;  %v77_v5 = vld [vmem:[%s3730_s0 + $0x1f8] sm:$0xff]  ;;  %v2429_v6 = vld [vmem:[%s3731_s2] ss:$0 sm:$0xff] }
  0x18   :  { %1782 = vmatmul.mubr.msk.f32.gmra.mrb[6].mxu0 %vm89_vm0, %v21_v20 }
  0x19   :  { %1830 = vmatmul.mubr.msk.f32.gmra.mrb[6].mxu1 %vm89_vm0, %v53_v21  ;;  %1784 = vmatprep.mubr.msk.f32.mxu0 %vm89_vm0, %v22_v22 }
  0x1a   :  { %1832 = vmatprep.mubr.msk.f32.mxu1 %vm89_vm0, %v54_v23 }
  0x1c   :  { %1785 = vmatmul.mubr.msk.f32.gmra.mrb[8].mxu0 %vm89_vm0, %v23_v24 }
  0x1d   :  { %1833 = vmatmul.mubr.msk.f32.gmra.mrb[8].mxu1 %vm89_vm0, %v55_v25  ;;  %1787 = vmatprep.mubr.msk.f32.mxu0 %vm89_vm0, %v24_v26 }
  0x1e   :  { %1835 = vmatprep.mubr.msk.f32.mxu1 %vm89_vm0, %v56_v27 }
  0x20   :  { %1788 = vmatmul.mubr.msk.f32.gmra.mrb[10].mxu0 %vm89_vm0, %v25_v28 }
  0x21   :  { %1836 = vmatmul.mubr.msk.f32.gmra.mrb[10].mxu1 %vm89_vm0, %v57_v29  ;;  %1790 = vmatprep.mubr.msk.f32.mxu0 %vm89_vm0, %v26_v30 }
  0x22   :  { %1838 = vmatprep.mubr.msk.f32.mxu1 %vm89_vm0, %v58_v31 }
  0x24   :  { %1791 = vmatmul.mubr.msk.f32.gmra.mrb[12].mxu0 %vm89_vm0, %v27_v32 }
  0x25   :  { %1839 = vmatmul.mubr.msk.f32.gmra.mrb[12].mxu1 %vm89_vm0, %v59_v33  ;;  %1793 = vmatprep.mubr.msk.f32.mxu0 %vm89_vm0, %v28_v34 }
  0x26   :  { %1841 = vmatprep.mubr.msk.f32.mxu1 %vm89_vm0, %v60_v35 }
  0x28   :  { %1794 = vmatmul.mubr.msk.f32.gmra.mrb[14].mxu0 %vm89_vm0, %v29_v36 }
  0x29   :  { %1842 = vmatmul.mubr.msk.f32.gmra.mrb[14].mxu1 %vm89_vm0, %v61_v37  ;;  %1796 = vmatprep.mubr.msk.f32.mxu0 %vm89_vm0, %v30_v38 }
  0x2a   :  { %1844 = vmatprep.mubr.msk.f32.mxu1 %vm89_vm0, %v62_v39 }
  0x2c   :  { %1797 = vmatmul.mubr.msk.f32.gmra.mrb[16].mxu0 %vm89_vm0, %v31_v40 }
  0x2d   :  { %1845 = vmatmul.mubr.msk.f32.gmra.mrb[16].mxu1 %vm89_vm0, %v63_v41  ;;  %1799 = vmatprep.mubr.msk.f32.mxu0 %vm89_vm0, %v32_v42 }
  0x2e   :  { %1847 = vmatprep.mubr.msk.f32.mxu1 %vm89_vm0, %v64_v43 }
  0x30   :  { %1800 = vmatmul.mubr.msk.f32.gmra.mrb[18].mxu0 %vm89_vm0, %v33_v44 }
  0x31   :  { %1848 = vmatmul.mubr.msk.f32.gmra.mrb[18].mxu1 %vm89_vm0, %v65_v45  ;;  %1802 = vmatprep.mubr.msk.f32.mxu0 %vm89_vm0, %v34_v46 }
  0x32   :  { %1850 = vmatprep.mubr.msk.f32.mxu1 %vm89_vm0, %v66_v47 }
  0x34   :  { %1803 = vmatmul.mubr.msk.f32.gmra.mrb[20].mxu0 %vm89_vm0, %v35_v48 }
  0x35   :  { %1851 = vmatmul.mubr.msk.f32.gmra.mrb[20].mxu1 %vm89_vm0, %v67_v49  ;;  %1805 = vmatprep.mubr.msk.f32.mxu0 %vm89_vm0, %v36_v50 }
  0x36   :  { %1853 = vmatprep.mubr.msk.f32.mxu1 %vm89_vm0, %v68_v51 }
  0x38   :  { %1806 = vmatmul.mubr.msk.f32.gmra.mrb[22].mxu0 %vm89_vm0, %v37_v52 }
  0x39   :  { %1854 = vmatmul.mubr.msk.f32.gmra.mrb[22].mxu1 %vm89_vm0, %v69_v53  ;;  %1808 = vmatprep.mubr.msk.f32.mxu0 %vm89_vm0, %v38_v54 }
  0x3a   :  { %1856 = vmatprep.mubr.msk.f32.mxu1 %vm89_vm0, %v70_v55 }
  0x3c   :  { %1809 = vmatmul.mubr.msk.f32.gmra.mrb[24].mxu0 %vm89_vm0, %v39_v56 }
  0x3d   :  { %1857 = vmatmul.mubr.msk.f32.gmra.mrb[24].mxu1 %vm89_vm0, %v71_v57  ;;  %1811 = vmatprep.mubr.msk.f32.mxu0 %vm89_vm0, %v40_v58 }
  0x3e   :  { %1859 = vmatprep.mubr.msk.f32.mxu1 %vm89_vm0, %v72_v59 }
  0x40   :  { %1812 = vmatmul.mubr.msk.f32.gmra.mrb[26].mxu0 %vm89_vm0, %v41_v60 }
  0x41   :  { %1860 = vmatmul.mubr.msk.f32.gmra.mrb[26].mxu1 %vm89_vm0, %v73_v61  ;;  %1814 = vmatprep.mubr.msk.f32.mxu0 %vm89_vm0, %v42_v62 }
  0x42   :  { %1862 = vmatprep.mubr.msk.f32.mxu1 %vm89_vm0, %v74_v63 }
  0x44   :  { %1815 = vmatmul.mubr.msk.f32.gmra.mrb[28].mxu0 %vm89_vm0, %v43_v0 }
  0x45   :  { %1863 = vmatmul.mubr.msk.f32.gmra.mrb[28].mxu1 %vm89_vm0, %v75_v1  ;;  %1817 = vmatprep.mubr.msk.f32.mxu0 %vm89_vm0, %v44_v2 }
  0x46   :  { %1865 = vmatprep.mubr.msk.f32.mxu1 %vm89_vm0, %v76_v3 }
  0x48   :  { %1818 = vmatmul.mubr.msk.f32.gmra.mrb[30].mxu0 %vm89_vm0, %v45_v4 }
  0x49   :  { %1866 = vmatmul.mubr.msk.f32.gmra.mrb[30].mxu1 %vm89_vm0, %v77_v5 }
  0xdf   :  { %v1774_v7 = vpop.f32.mrb[0].mxu0 }
  0xe0   :  { %v1822_v8 = vpop.f32.mrb[0].mxu1  ;;  %v2432_v9 = vadd.f32 %v1774_v7, %v2429_v6  ;;  %v348_v11 = vpop.f32.mrb[1].mxu0 }
  0xe1   :  { %v2435_v10 = vadd.f32 %v1822_v8, %v2429_v6  ;;  %v508_v12 = vpop.f32.mrb[1].mxu1  ;;  %v2438_v13 = vadd.f32 %v2429_v6, %v348_v11 }
  0xe2   :  { %v2441_v14 = vadd.f32 %v2429_v6, %v508_v12  ;;  %v668_v15 = vmin.f32 %v2432_v9, 20.0  ;;  %vm1436_vm1 = vcmp.gt.f32.partialorder %v2432_v9, 20.0 }
  0xe3   :  { %v700_v16 = vmin.f32 %v2435_v10, 20.0  ;;  %v667_v17 = vmin.f32 %v2438_v13, 20.0  ;;  %v1777_v19 = vpop.f32.mrb[2].mxu0  ;;  %vm1468_vm2 = vcmp.gt.f32.partialorder %v2435_v10, 20.0  ;;  %vm1435_vm3 = vcmp.gt.f32.partialorder %v2438_v13, 20.0 }
  0xe4   :  { %v699_v18 = vmin.f32 %v2441_v14, 20.0  ;;  %v1825_v20 = vpop.f32.mrb[2].mxu1  ;;  %v733_v21 = vmul.f32 1.442695, %v668_v15  ;;  %v2448_v23 = vadd.f32 %v1777_v19, %v2429_v6  ;;  %v358_v25 = vpop.f32.mrb[3].mxu0  ;;  %vm1467_vm4 = vcmp.gt.f32.partialorder %v2441_v14, 20.0 }
  0xe5   :  { %v797_v22 = vmul.f32 1.442695, %v700_v16  ;;  %v2451_v24 = vadd.f32 %v1825_v20, %v2429_v6  ;;  %v518_v26 = vpop.f32.mrb[3].mxu1  ;;  %v731_v27 = vmul.f32 1.442695, %v667_v17  ;;  %v2454_v29 = vadd.f32 %v2429_v6, %v358_v25 }
  0xe6   :  { %v795_v28 = vmul.f32 1.442695, %v699_v18  ;;  %v2457_v30 = vadd.f32 %v2429_v6, %v518_v26  ;;  %1880 = vpow2.f32 %v733_v21  ;;  %v670_v31 = vmin.f32 %v2448_v23, 20.0 }
  0xe7   :  { %v702_v32 = vmin.f32 %v2451_v24, 20.0  ;;  %1882 = vpow2.f32 %v797_v22  ;;  %v669_v33 = vmin.f32 %v2454_v29, 20.0  ;;  %v1780_v34 = vpop.f32.mrb[4].mxu0  ;;  %vm1438_vm5 = vcmp.gt.f32.partialorder %v2448_v23, 20.0 }
  0xe8   :  { %v1828_v35 = vpop.f32.mrb[4].mxu1  ;;  %1884 = vpow2.f32 %v731_v27  ;;  %v737_v36 = vmul.f32 1.442695, %v670_v31  ;;  %v701_v38 = vmin.f32 %v2457_v30, 20.0  ;;  %v368_v39 = vpop.f32.mrb[5].mxu0  ;;  %v2464_v41 = vadd.f32 %v1780_v34, %v2429_v6 }
  0xe9   :  { %v801_v37 = vmul.f32 1.442695, %v702_v32  ;;  %1886 = vpow2.f32 %v795_v28  ;;  %v735_v40 = vmul.f32 1.442695, %v669_v33  ;;  %v528_v42 = vpop.f32.mrb[5].mxu1  ;;  %v2467_v44 = vadd.f32 %v1828_v35, %v2429_v6 }
  0xea   :  { %1888 = vpow2.f32 %v737_v36  ;;  %v799_v43 = vmul.f32 1.442695, %v701_v38  ;;  %v2470_v45 = vadd.f32 %v2429_v6, %v368_v39  ;;  %v672_v46 = vmin.f32 %v2464_v41, 20.0 }
  0xeb   :  { %1890 = vpow2.f32 %v801_v37  ;;  %v2474_v47 = vadd.f32 %v2429_v6, %v528_v42  ;;  %v1783_v48 = vpop.f32.mrb[6].mxu0  ;;  %v704_v50 = vmin.f32 %v2467_v44, 20.0  ;;  %vm1470_vm6 = vcmp.gt.f32.partialorder %v2451_v24, 20.0 }
  0xec   :  { %v1831_v49 = vpop.f32.mrb[6].mxu1  ;;  %1892 = vpow2.f32 %v735_v40  ;;  %v671_v51 = vmin.f32 %v2470_v45, 20.0  ;;  %v378_v52 = vpop.f32.mrb[7].mxu0  ;;  %v741_v54 = vmul.f32 1.442695, %v672_v46  ;;  %v2480_v58 = vadd.f32 %v1783_v48, %v2429_v6 }
  0xed   :  { %v538_v53 = vpop.f32.mrb[7].mxu1  ;;  %1894 = vpow2.f32 %v799_v43  ;;  %v703_v55 = vmin.f32 %v2474_v47, 20.0  ;;  %v805_v56 = vmul.f32 1.442695, %v704_v50  ;;  %v2483_v60 = vadd.f32 %v1831_v49, %v2429_v6 }
  0xee   :  { %v739_v57 = vmul.f32 1.442695, %v671_v51  ;;  %1896 = vpow2.f32 %v741_v54  ;;  %v2486_v61 = vadd.f32 %v2429_v6, %v378_v52  ;;  %v674_v1 = vmin.f32 %v2480_v58, 20.0 }
  0xef   :  { %v803_v59 = vmul.f32 1.442695, %v703_v55  ;;  %3739 = vst [vmem:[#allocation2_spill] sm:$0xff] %v2483_v60  ;;  %v2488_v62 = vpop.f32.mrb[8].mxu0  ;;  %1898 = vpow2.f32 %v805_v56  ;;  %v706_v12 = vmin.f32 %v2483_v60, 20.0  ;;  %v2510_v34 = vadd.f32 %v2429_v6, %v538_v53 }
  0xf0   :  { %3740 = vst [vmem:[#allocation3_spill] sm:$0xff] %v2486_v61  ;;  %v2490_v63 = vpop.f32.mrb[8].mxu1  ;;  %v1881_v0 = vpop.eup %1880  ;;  %1900 = vpow2.f32 %v739_v57  ;;  %v745_v11 = vmul.f32 1.442695, %v674_v1  ;;  %v673_v18 = vmin.f32 %v2486_v61, 20.0  ;;  %vm1437_vm7 = vcmp.gt.f32.partialorder %v2454_v29, 20.0 }
  0xf1   :  { %v2493_v2 = vpop.f32.mrb[9].mxu0  ;;  %v2495_v3 = vpop.f32.mrb[9].mxu1  ;;  %v860_v5 = vadd.f32 2.0, %v1881_v0  ;;  %1902 = vpow2.f32 %v803_v59  ;;  %3743 = vst [vmem:[#allocation6_spill] sm:$0xff] %v2510_v34  ;;  %v2514_v39 = vmul.f32 1.442695, %v706_v12 }
  0xf2   :  { %v1883_v4 = vpop.eup %1882  ;;  %1904 = vpow2.f32 %v745_v11  ;;  %v2519_v46 = vmul.f32 1.442695, %v673_v18  ;;  %vm1469_vm8 = vcmp.gt.f32.partialorder %v2457_v30, 20.0  ;;  %vm1440_vm9 = vcmp.gt.f32.partialorder %v2464_v41, 20.0 }
  0xf3   :  { %v1885_v7 = vpop.eup %1884  ;;  %v892_v8 = vadd.f32 2.0, %v1883_v4  ;;  %v924_v16 = vmul.f32 %v1881_v0, %v860_v5  ;;  %v2499_v19 = vpop.f32.mrb[10].mxu0  ;;  %vm1472_vm10 = vcmp.gt.f32.partialorder %v2467_v44, 20.0  ;;  %vm1439_vm11 = vcmp.gt.f32.partialorder %v2470_v45, 20.0 }
  0xf4   :  { %v1887_v15 = vpop.eup %1886  ;;  %v859_v17 = vadd.f32 2.0, %v1885_v7  ;;  %v2501_v20 = vpop.f32.mrb[10].mxu1  ;;  %vm1471_vm12 = vcmp.gt.f32.partialorder %v2474_v47, 20.0  ;;  %vm1442_vm13 = vcmp.gt.f32.partialorder %v2480_v58, 20.0 }
  0xf5   :  { %v1889_v21 = vpop.eup %1888  ;;  %v956_v22 = vmul.f32 %v1883_v4, %v892_v8  ;;  %v891_v25 = vadd.f32 2.0, %v1887_v15  ;;  %v2503_v26 = vpop.f32.mrb[11].mxu0  ;;  %v2507_v31 = vadd.f32 2.0, %v924_v16  ;;  %v2526_v50 = vmul.f32 %v924_v16, %v2432_v9 }
  0xf6   :  { %3741 = vst [vmem:[#allocation4_spill] sm:$0xff] %v2503_v26  ;;  %v2505_v27 = vpop.f32.mrb[11].mxu1  ;;  %v1891_v28 = vpop.eup %1890  ;;  %v923_v32 = vmul.f32 %v1885_v7, %v859_v17  ;;  %v862_v33 = vadd.f32 2.0, %v1889_v21 }
  0xf7   :  { %3742 = vst [vmem:[#allocation5_spill] sm:$0xff] %v2505_v27  ;;  %v1893_v35 = vpop.eup %1892  ;;  %v2512_v36 = vadd.f32 2.0, %v956_v22  ;;  %v955_v37 = vmul.f32 %v1887_v15, %v891_v25  ;;  %v894_v38 = vadd.f32 2.0, %v1891_v28  ;;  %1906 = vrcp.f32 %v2507_v31  ;;  %v2521_v48 = vpop.f32.mrb[12].mxu0 }
  0xf8   :  { %v1895_v40 = vpop.eup %1894  ;;  %v2517_v42 = vadd.f32 2.0, %v923_v32  ;;  %v926_v43 = vmul.f32 %v1889_v21, %v862_v33  ;;  %3744 = vst [vmem:[#allocation7_spill] sm:$0xff] %v2521_v48  ;;  %v2523_v49 = vpop.f32.mrb[12].mxu1  ;;  %v2536_v56 = vmul.f32 %v956_v22, %v2435_v10  ;;  %v861_v59 = vadd.f32 2.0, %v1893_v35 }
  0xf9   :  { %3745 = vst [vmem:[#allocation8_spill] sm:$0xff] %v2523_v49  ;;  %1908 = vrcp.f32 %v2512_v36  ;;  %v2529_v51 = vadd.f32 2.0, %v955_v37  ;;  %v958_v52 = vmul.f32 %v1891_v28, %v894_v38  ;;  %v2531_v53 = vpop.f32.mrb[13].mxu0  ;;  %v2533_v54 = vpop.f32.mrb[13].mxu1  ;;  %v2542_v1 = vmul.f32 %v923_v32, %v2438_v13 }
  0xfa   :  { %3746 = vst [vmem:[#allocation9_spill] sm:$0xff] %v2531_v53  ;;  %3747 = vst [vmem:[#allocation10_spill] sm:$0xff] %v2533_v54  ;;  %v1897_v55 = vpop.eup %1896  ;;  %1910 = vrcp.f32 %v2517_v42  ;;  %v2539_v57 = vadd.f32 2.0, %v926_v43  ;;  %v893_v5 = vadd.f32 2.0, %v1895_v40  ;;  %v925_v8 = vmul.f32 %v1893_v35, %v861_v59 }
  0xfb   :  { %v1899_v0 = vpop.eup %1898  ;;  %1912 = vrcp.f32 %v2529_v51  ;;  %v2545_v4 = vadd.f32 2.0, %v958_v52  ;;  %v864_v11 = vadd.f32 2.0, %v1897_v55  ;;  %v2548_v15 = vpop.f32.mrb[14].mxu0  ;;  %v2553_v18 = vmul.f32 %v955_v37, %v2441_v14 }
  0xfc   :  { %v1901_v7 = vpop.eup %1900  ;;  %1914 = vrcp.f32 %v2539_v57  ;;  %v896_v12 = vadd.f32 2.0, %v1899_v0  ;;  %3748 = vst [vmem:[#allocation11_spill] sm:$0xff] %v2548_v15  ;;  %v2550_v16 = vpop.f32.mrb[14].mxu1  ;;  %v957_v21 = vmul.f32 %v1895_v40, %v893_v5  ;;  %v2561_v32 = vmul.f32 %v926_v43, %v2448_v23 }
  0xfd   :  { %3749 = vst [vmem:[#allocation12_spill] sm:$0xff] %v2550_v16  ;;  %v1903_v17 = vpop.eup %1902  ;;  %1916 = vrcp.f32 %v2545_v4  ;;  %v863_v22 = vadd.f32 2.0, %v1901_v7  ;;  %v2556_v25 = vpop.f32.mrb[15].mxu0  ;;  %v2563_v33 = vadd.f32 2.0, %v925_v8  ;;  %v928_v35 = vmul.f32 %v1897_v55, %v864_v11 }
  0xfe   :  { %3750 = vst [vmem:[#allocation13_spill] sm:$0xff] %v2556_v25  ;;  %v2558_v28 = vpop.f32.mrb[15].mxu1  ;;  %v960_v38 = vmul.f32 %v1899_v0, %v896_v12  ;;  %v1905_v59 = vpop.eup %1904  ;;  %v2566_v16 = vmul.f32 %v958_v52, %v2451_v24  ;;  %v2568_v37 = vadd.f32 2.0, %v957_v21  ;;  %v895_v40 = vadd.f32 2.0, %v1903_v17 }
  0xff   :  { %3751 = vst [vmem:[#allocation14_spill] sm:$0xff] %v2558_v28  ;;  %v927_v15 = vmul.f32 %v1901_v7, %v863_v22  ;;  %1918 = vrcp.f32 %v2563_v33  ;;  %v2571_v5 = vadd.f32 2.0, %v928_v35  ;;  %v705_v43 = vmin.f32 %v2510_v34, 20.0  ;;  %v2576_v25 = vpop.f32.mrb[16].mxu0 }
 0x100   :  { %v2573_v28 = vadd.f32 2.0, %v960_v38  ;;  %3752 = vst [vmem:[#allocation15_spill] sm:$0xff] %v2576_v25  ;;  %v2578_v55 = vpop.f32.mrb[16].mxu1  ;;  %v2581_v0 = vmul.f32 %v925_v8, %v2454_v29  ;;  %1920 = vrcp.f32 %v2568_v37  ;;  %v2585_v52 = vmul.f32 %v957_v21, %v2457_v30  ;;  %v2589_v11 = vpop.f32.mrb[17].mxu0 }
 0x101   :  { %3753 = vst [vmem:[#allocation16_spill] sm:$0xff] %v2578_v55  ;;  %v2587_v7 = vadd.f32 2.0, %v927_v15  ;;  %3754 = vst [vmem:[#allocation17_spill] sm:$0xff] %v2589_v11  ;;  %v2591_v12 = vpop.f32.mrb[17].mxu1  ;;  %v1907_v22 = vpop.eup %1906  ;;  %1922 = vrcp.f32 %v2571_v5  ;;  %v2596_v55 = vmul.f32 %v928_v35, %v2464_v41  ;;  %v2598_v8 = vmul.f32 %v1903_v17, %v895_v40 }
 0x102   :  { %3755 = vst [vmem:[#allocation18_spill] sm:$0xff] %v2591_v12  ;;  %v866_v25 = vadd.f32 2.0, %v1905_v59  ;;  %v1116_v21 = vmul.f32 %v1907_v22, %v2507_v31  ;;  %1924 = vrcp.f32 %v2573_v28  ;;  %v2604_v12 = vmul.f32 %v960_v38, %v2467_v44 }
 0x103   :  { %v1909_v34 = vpop.eup %1908  ;;  %v2607_v11 = vmul.f32 %v927_v15, %v2470_v45  ;;  %1926 = vrcp.f32 %v2587_v7  ;;  %v2613_v17 = vadd.f32 2.0, %v2598_v8  ;;  %v2617_v31 = vadd.f32 %v2488_v62, %v2429_v6  ;;  %v2619_v40 = vpop.f32.mrb[18].mxu0 }
 0x104   :  { %v1911_v54 = vpop.eup %1910  ;;  %v1148_v35 = vmul.f32 %v1909_v34, %v2512_v36  ;;  %3756 = vst [vmem:[#allocation19_spill] sm:$0xff] %v2619_v40  ;;  %v2621_v38 = vpop.f32.mrb[18].mxu1  ;;  %v1180_v61 = vsub.f32 2.0, %v1116_v21  ;;  %v2625_v36 = vmul.f32 %v1905_v59, %v866_v25  ;;  %1928 = vpow2.f32 %v2514_v39 }
 0x105   :  { %3757 = vst [vmem:[#allocation20_spill] sm:$0xff] %v2621_v38  ;;  %v1913_v15 = vpop.eup %1912  ;;  %v1115_v53 = vmul.f32 %v1911_v54, %v2517_v42  ;;  %v2628_v60 = vpop.f32.mrb[19].mxu0  ;;  %1930 = vrcp.f32 %v2613_v17  ;;  %v2635_v21 = vmul.f32 1.442695, %v705_v43 }
 0x106   :  { %3758 = vst [vmem:[#allocation21_spill] sm:$0xff] %v2628_v60  ;;  %v2630_v49 = vpop.f32.mrb[19].mxu1  ;;  %v1915_v62 = vpop.eup %1914  ;;  %v1212_v48 = vsub.f32 2.0, %v1148_v35  ;;  %v1147_v40 = vmul.f32 %v1913_v15, %v2529_v51  ;;  %v1244_v38 = vmul.f32 %v1907_v22, %v1180_v61  ;;  %v2640_v39 = vadd.f32 2.0, %v2625_v36 }
 0x107   :  { %3759 = vst [vmem:[#allocation22_spill] sm:$0xff] %v2630_v49  ;;  %v1917_v42 = vpop.eup %1916  ;;  %v1179_v25 = vsub.f32 2.0, %v1115_v53  ;;  %v1118_v59 = vmul.f32 %v1915_v62, %v2539_v57  ;;  %v2644_v27 = vpop.f32.mrb[20].mxu0 }
 0x108   :  { %v1276_v49 = vmul.f32 %v1909_v34, %v1212_v48  ;;  %v1211_v35 = vsub.f32 2.0, %v1147_v40  ;;  %v1150_v51 = vmul.f32 %v1917_v42, %v2545_v4  ;;  %v2646_v43 = vpop.f32.mrb[20].mxu1  ;;  %v1372_v61 = vmul.f32 %v2526_v50, %v1244_v38  ;;  %v2650_v57 = vpop.f32.mrb[21].mxu0 }
 0x109   :  { %v1243_v53 = vmul.f32 %v1911_v54, %v1179_v25  ;;  %v1182_v22 = vsub.f32 2.0, %v1118_v59  ;;  %1932 = vrcp.f32 %v2640_v39  ;;  %v2652_v26 = vpop.f32.mrb[21].mxu1  ;;  %v1919_v34 = vpop.eup %1918 }
 0x10a   :  { %v1404_v48 = vmul.f32 %v2536_v56, %v1276_v49  ;;  %v1275_v4 = vmul.f32 %v1913_v15, %v1211_v35  ;;  %v1214_v40 = vsub.f32 2.0, %v1150_v51  ;;  %1934 = vpow2.f32 %v2519_v46  ;;  %v1921_v60 = vpop.eup %1920 }
 0x10b   :  { %v1500_v50 = vsel %vm1436_vm1, %v2432_v9, %v1372_v61  ;;  %v1371_v54 = vmul.f32 %v2542_v1, %v1243_v53  ;;  %v1246_v38 = vmul.f32 %v1915_v62, %v1182_v22  ;;  %v1117_v25 = vmul.f32 %v1919_v34, %v2563_v33  ;;  %v1923_v59 = vpop.eup %1922  ;;  %v2673_v1 = vpop.f32.mrb[22].mxu0 }
 0x10c   :  { %1564 = vst.msk [vmem:[%s3732_s3 + $0x8] sm:$0xff] %vm89_vm0, %v1500_v50  ;;  %v1532_v46 = vsel %vm1468_vm2, %v2435_v10, %v1404_v48  ;;  %v1403_v49 = vmul.f32 %v2553_v18, %v1275_v4  ;;  %v1278_v9 = vmul.f32 %v1917_v42, %v1214_v40  ;;  %v1149_v56 = vmul.f32 %v1921_v60, %v2568_v37  ;;  %v2675_v33 = vpop.f32.mrb[22].mxu1  ;;  %v1925_v15 = vpop.eup %1924 }
 0x10d   :  { %1596 = vst.msk [vmem:[%s3732_s3 + $0x108] sm:$0xff] %vm89_vm0, %v1532_v46  ;;  %v1499_v10 = vsel %vm1435_vm3, %v2438_v13, %v1371_v54  ;;  %v1374_v18 = vmul.f32 %v2561_v32, %v1246_v38  ;;  %v1181_v62 = vsub.f32 2.0, %v1117_v25  ;;  %v1120_v37 = vmul.f32 %v1923_v59, %v2571_v5  ;;  %v2687_v42 = vpop.f32.mrb[23].mxu0  ;;  %v2689_v35 = vpop.f32.mrb[23].mxu1 }
 0x10e   :  { %v1927_v51 = vpop.eup %1926  ;;  %1563 = vst.msk [vmem:[%s3732_s3] sm:$0xff] %vm89_vm0, %v1499_v10  ;;  %v1531_v13 = vsel %vm1467_vm4, %v2441_v14, %v1403_v49  ;;  %v1406_v32 = vmul.f32 %v2566_v16, %v1278_v9  ;;  %v1213_v61 = vsub.f32 2.0, %v1149_v56  ;;  %v1152_v5 = vmul.f32 %v1925_v15, %v2573_v28 }
 0x10f   :  { %v1929_v53 = vpop.eup %1928  ;;  %1595 = vst.msk [vmem:[%s3732_s3 + $0x100] sm:$0xff] %vm89_vm0, %v1531_v13  ;;  %v1502_v22 = vsel %vm1438_vm5, %v2448_v23, %v1374_v18  ;;  %v1245_v48 = vmul.f32 %v1919_v34, %v1181_v62  ;;  %v1184_v4 = vsub.f32 2.0, %v1120_v37  ;;  %v1119_v14 = vmul.f32 %v1927_v51, %v2587_v7  ;;  %v2717_v23 = vpop.f32.mrb[24].mxu0 }
 0x110   :  { %v1931_v16 = vpop.eup %1930  ;;  %1566 = vst.msk [vmem:[%s3732_s3 + $0x18] sm:$0xff] %vm89_vm0, %v1502_v22  ;;  %v1534_v28 = vsel %vm1470_vm6, %v2451_v24, %v1406_v32  ;;  %v1277_v40 = vmul.f32 %v1921_v60, %v1213_v61  ;;  %v1216_v50 = vsub.f32 2.0, %v1152_v5  ;;  %v898_v54 = vadd.f32 2.0, %v1929_v53  ;;  %v2719_v34 = vpop.f32.mrb[24].mxu1 }
 0x111   :  { %1598 = vst.msk [vmem:[%s3732_s3 + $0x118] sm:$0xff] %vm89_vm0, %v1534_v28  ;;  %v1373_v7 = vmul.f32 %v2581_v0, %v1245_v48  ;;  %v1248_v38 = vmul.f32 %v1923_v59, %v1184_v4  ;;  %v1183_v25 = vsub.f32 2.0, %v1119_v14  ;;  %v1151_v24 = vmul.f32 %v1931_v16, %v2613_v17  ;;  %v2727_v60 = vpop.f32.mrb[25].mxu0  ;;  %v2729_v46 = vpop.f32.mrb[25].mxu1 }
 0x112   :  { %3760 = vst [vmem:[#allocation23_spill] sm:$0xff] %v2727_v60  ;;  %3761 = vst [vmem:[#allocation24_spill] sm:$0xff] %v2729_v46  ;;  %v1405_v49 = vmul.f32 %v2585_v52, %v1277_v40  ;;  %v1280_v9 = vmul.f32 %v1925_v15, %v1216_v50  ;;  %v2732_v56 = vmul.f32 %v1929_v53, %v898_v54  ;;  %1936 = vpow2.f32 %v2635_v21 }
 0x113   :  { %v1933_v10 = vpop.eup %1932  ;;  %v1501_v0 = vsel %vm1437_vm7, %v2454_v29, %v1373_v7  ;;  %v1376_v59 = vmul.f32 %v2596_v55, %v1248_v38  ;;  %v1247_v18 = vmul.f32 %v1927_v51, %v1183_v25  ;;  %v1215_v17 = vsub.f32 2.0, %v1151_v24  ;;  %v2749_v37 = vpop.f32.mrb[26].mxu0 }
 0x114   :  { %v1935_v62 = vpop.eup %1934  ;;  %1565 = vst.msk [vmem:[%s3732_s3 + $0x10] sm:$0xff] %vm89_vm0, %v1501_v0  ;;  %v1533_v52 = vsel %vm1469_vm8, %v2457_v30, %v1405_v49  ;;  %v1408_v21 = vmul.f32 %v2604_v12, %v1280_v9  ;;  %v1122_v15 = vmul.f32 %v1933_v10, %v2640_v39  ;;  %v1026_v29 = vadd.f32 2.0, %v2732_v56  ;;  %3762 = vst [vmem:[#allocation25_spill] sm:$0xff] %v2749_v37  ;;  %v2751_v55 = vpop.f32.mrb[26].mxu1  ;;  %v3767_v9 = vld [vmem:[#allocation4_spill] sm:$0xff] }
 0x115   :  { %3763 = vst [vmem:[#allocation26_spill] sm:$0xff] %v2751_v55  ;;  %1597 = vst.msk [vmem:[%s3732_s3 + $0x110] sm:$0xff] %vm89_vm0, %v1533_v52  ;;  %v1504_v51 = vsel %vm1440_vm9, %v2464_v41, %v1376_v59  ;;  %v1375_v30 = vmul.f32 %v2607_v11, %v1247_v18  ;;  %v1279_v12 = vmul.f32 %v1931_v16, %v1215_v17  ;;  %v2763_v13 = vpop.f32.mrb[27].mxu0  ;;  %v865_v41 = vadd.f32 2.0, %v1935_v62  ;;  %v2772_v5 = vpop.f32.mrb[27].mxu1  ;;  %v3768_v59 = vld [vmem:[#allocation5_spill] sm:$0xff] }
 0x116   :  { %v1343_v39 = vmul.f32 %v2598_v8, %v2474_v47  ;;  %3764 = vst [vmem:[#allocation27_spill] sm:$0xff] %v2763_v13  ;;  %1568 = vst.msk [vmem:[%s3732_s3 + $0x28] sm:$0xff] %vm89_vm0, %v1504_v51  ;;  %v1536_v32 = vsel %vm1472_vm10, %v2467_v44, %v1408_v21  ;;  %v1186_v61 = vsub.f32 2.0, %v1122_v15  ;;  %1938 = vrcp.f32 %v1026_v29 }
 0x117   :  { %3765 = vst [vmem:[#allocation28_spill] sm:$0xff] %v2772_v5  ;;  %1600 = vst.msk [vmem:[%s3732_s3 + $0x128] sm:$0xff] %vm89_vm0, %v1536_v32  ;;  %v1503_v11 = vsel %vm1439_vm11, %v2470_v45, %v1375_v30  ;;  %v1314_v53 = vmul.f32 %v2625_v36, %v2480_v58  ;;  %v3766_v44 = vmin.f32 %v2617_v31, 20.0  ;;  %v2789_v4 = vmul.f32 %v1935_v62, %v865_v41  ;;  %v2842_v15 = vpop.f32.mrb[28].mxu0  ;;  %v3771_v41 = vld [vmem:[#allocation7_spill] sm:$0xff] }
 0x118   :  { %v1407_v8 = vmul.f32 %v1343_v39, %v1279_v12  ;;  %1567 = vst.msk [vmem:[%s3732_s3 + $0x20] sm:$0xff] %vm89_vm0, %v1503_v11  ;;  %v1250_v48 = vmul.f32 %v1933_v10, %v1186_v61  ;;  %v2793_v14 = vadd.f32 %v2490_v63, %v2429_v6  ;;  %v2797_v45 = vadd.f32 %v2429_v6, %v2493_v2  ;;  %v2844_v51 = vpop.f32.mrb[28].mxu1 }
 0x119   :  { %v749_v22 = vmul.f32 1.442695, %v3766_v44  ;;  %v2804_v16 = vadd.f32 %v2429_v6, %v2495_v3  ;;  %v2808_v28 = vadd.f32 %v2499_v19, %v2429_v6  ;;  %v993_v2 = vadd.f32 2.0, %v2789_v4  ;;  %3769 = vst [vmem:[#allocation4_spill] sm:$0xff] %v2842_v15  ;;  %3770 = vst [vmem:[#allocation5_spill] sm:$0xff] %v2844_v51 }
 0x11a   :  { %v1535_v36 = vsel %vm1471_vm12, %v2474_v47, %v1407_v8  ;;  %v1378_v63 = vmul.f32 %v1314_v53, %v1250_v48  ;;  %v708_v40 = vmin.f32 %v2793_v14, 20.0  ;;  %v675_v47 = vmin.f32 %v2797_v45, 20.0  ;;  %v3772_v53 = vld [vmem:[#allocation8_spill] sm:$0xff] }
 0x11b   :  { %1940 = vpow2.f32 %v749_v22  ;;  %1599 = vst.msk [vmem:[%s3732_s3 + $0x120] sm:$0xff] %vm89_vm0, %v1535_v36  ;;  %v707_v3 = vmin.f32 %v2804_v16, 20.0  ;;  %v678_v24 = vmin.f32 %v2808_v28, 20.0  ;;  %v2827_v49 = vadd.f32 %v2501_v20, %v2429_v6  ;;  %v2855_v22 = vpop.f32.mrb[29].mxu0  ;;  %v3774_v36 = vld [vmem:[#allocation2_spill] sm:$0xff] }
 0x11c   :  { %v1937_v50 = vpop.eup %1936  ;;  %v1506_v19 = vsel %vm1442_vm13, %v2480_v58, %v1378_v63  ;;  %1942 = vrcp.f32 %v993_v2  ;;  %v813_v54 = vmul.f32 1.442695, %v708_v40  ;;  %v747_v38 = vmul.f32 1.442695, %v675_v47  ;;  %3773 = vst [vmem:[#allocation7_spill] sm:$0xff] %v2855_v22 }
 0x11d   :  { %1570 = vst.msk [vmem:[%s3732_s3 + $0x38] sm:$0xff] %vm89_vm0, %v1506_v19  ;;  %v897_v7 = vadd.f32 2.0, %v1937_v50  ;;  %v811_v25 = vmul.f32 1.442695, %v707_v3  ;;  %v2831_v58 = vadd.f32 %v2429_v6, %v3767_v9  ;;  %v753_v0 = vmul.f32 1.442695, %v678_v24 }
 0x11e   :  { %1944 = vpow2.f32 %v813_v54  ;;  %v2837_v18 = vadd.f32 %v2429_v6, %v3768_v59  ;;  %v710_v62 = vmin.f32 %v2827_v49, 20.0  ;;  %v2849_v11 = vadd.f32 %v3771_v41, %v2429_v6 }
 0x11f   :  { %v2833_v10 = vmul.f32 %v1937_v50, %v897_v7  ;;  %1946 = vpow2.f32 %v747_v38  ;;  %v677_v52 = vmin.f32 %v2831_v58, 20.0  ;;  %v2853_v44 = vadd.f32 %v3772_v53, %v2429_v6  ;;  %v3775_v38 = vld [vmem:[#allocation9_spill] sm:$0xff] }
 0x120   :  { %v1939_v17 = vpop.eup %1938  ;;  %1948 = vpow2.f32 %v811_v25  ;;  %v817_v30 = vmul.f32 1.442695, %v710_v62  ;;  %v709_v39 = vmin.f32 %v2837_v18, 20.0  ;;  %v1346_v63 = vmul.f32 %v2732_v56, %v3774_v36  ;;  %v3776_v56 = vld [vmem:[#allocation3_spill] sm:$0xff] }
 0x121   :  { %v1154_v20 = vmul.f32 %v1939_v17, %v1026_v29  ;;  %v1025_v21 = vadd.f32 2.0, %v2833_v10  ;;  %1950 = vpow2.f32 %v753_v0  ;;  %v751_v12 = vmul.f32 1.442695, %v677_v52 }
 0x122   :  { %v815_v29 = vmul.f32 1.442695, %v709_v39  ;;  %v680_v40 = vmin.f32 %v2849_v11, 20.0  ;;  %v712_v50 = vmin.f32 %v2853_v44, 20.0  ;;  %v2865_v25 = vadd.f32 %v2429_v6, %v3775_v38 }
 0x123   :  { %v1218_v61 = vsub.f32 2.0, %v1154_v20  ;;  %1952 = vrcp.f32 %v1025_v21  ;;  %vm1474_vm14 = vcmp.gt.f32.partialorder %v3774_v36, 20.0  ;;  %v1313_v9 = vmul.f32 %v2789_v4, %v3776_v56 }
 0x124   :  { %1954 = vpow2.f32 %v817_v30  ;;  %v757_v7 = vmul.f32 1.442695, %v680_v40  ;;  %v821_v59 = vmul.f32 1.442695, %v712_v50  ;;  %v679_v4 = vmin.f32 %v2865_v25, 20.0 }
 0x125   :  { %v1941_v32 = vpop.eup %1940  ;;  %v1282_v48 = vmul.f32 %v1939_v17, %v1218_v61  ;;  %1956 = vpow2.f32 %v751_v12  ;;  %v3777_v12 = vld [vmem:[#allocation10_spill] sm:$0xff]  ;;  %vm1441_vm15 = vcmp.gt.f32.partialorder %v3776_v56, 20.0  ;;  %vm1444_vm2 = vcmp.gt.f32.partialorder %v2617_v31, 20.0 }
 0x126   :  { %v868_v8 = vadd.f32 2.0, %v1941_v32  ;;  %v1943_v47 = vpop.eup %1942  ;;  %1958 = vpow2.f32 %v815_v29  ;;  %v2882_v39 = vadd.f32 %v2429_v6, %v3777_v12  ;;  %v2884_v29 = vpop.f32.mrb[29].mxu1  ;;  %vm1476_vm3 = vcmp.gt.f32.partialorder %v2793_v14, 20.0 }
 0x127   :  { %v1410_v19 = vmul.f32 %v1346_v63, %v1282_v48  ;;  %v1121_v54 = vmul.f32 %v1943_v47, %v993_v2  ;;  %1960 = vpow2.f32 %v757_v7  ;;  %3778 = vst [vmem:[#allocation8_spill] sm:$0xff] %v2884_v29  ;;  %vm1443_vm4 = vcmp.gt.f32.partialorder %v2797_v45, 20.0 }
 0x128   :  { %v2860_v3 = vmul.f32 %v1941_v32, %v868_v8  ;;  %v1945_v24 = vpop.eup %1944  ;;  %vm1475_vm5 = vcmp.gt.f32.partialorder %v2804_v16, 20.0  ;;  %vm1446_vm6 = vcmp.gt.f32.partialorder %v2808_v28, 20.0  ;;  %vm1478_vm7 = vcmp.gt.f32.partialorder %v2827_v49, 20.0 }
 0x129   :  { %v1947_v17 = vpop.eup %1946  ;;  %v1538_v62 = vsel %vm1474_vm14, %v3774_v36, %v1410_v19  ;;  %v1185_v52 = vsub.f32 2.0, %v1121_v54  ;;  %v900_v2 = vadd.f32 2.0, %v1945_v24  ;;  %vm1445_vm8 = vcmp.gt.f32.partialorder %v2831_v58, 20.0 }
 0x12a   :  { %v2871_v0 = vadd.f32 2.0, %v2860_v3  ;;  %v1949_v20 = vpop.eup %1948  ;;  %1602 = vst.msk [vmem:[%s3732_s3 + $0x138] sm:$0xff] %vm89_vm0, %v1538_v62  ;;  %v867_v30 = vadd.f32 2.0, %v1947_v17  ;;  %vm1477_vm9 = vcmp.gt.f32.partialorder %v2837_v18, 20.0  ;;  %vm1448_vm10 = vcmp.gt.f32.partialorder %v2849_v11, 20.0 }
 0x12b   :  { %v1951_v32 = vpop.eup %1950  ;;  %v1249_v61 = vmul.f32 %v1943_v47, %v1185_v52  ;;  %v964_v41 = vmul.f32 %v1945_v24, %v900_v2  ;;  %v899_v8 = vadd.f32 2.0, %v1949_v20  ;;  %v711_v47 = vmin.f32 %v2882_v39, 20.0  ;;  %v3779_v52 = vld [vmem:[#allocation6_spill] sm:$0xff] }
 0x12c   :  { %1962 = vrcp.f32 %v2871_v0  ;;  %v931_v53 = vmul.f32 %v1947_v17, %v867_v30  ;;  %v870_v48 = vadd.f32 2.0, %v1951_v32  ;;  %vm1473_vm1 = vcmp.gt.f32.partialorder %v3779_v52, 20.0 }
 0x12d   :  { %1964 = vpow2.f32 %v821_v59  ;;  %v1953_v36 = vpop.eup %1952  ;;  %v1377_v63 = vmul.f32 %v1313_v9, %v1249_v61  ;;  %v2887_v40 = vadd.f32 2.0, %v964_v41  ;;  %v963_v50 = vmul.f32 %v1949_v20, %v899_v8 }
 0x12e   :  { %v1955_v19 = vpop.eup %1954  ;;  %v1153_v54 = vmul.f32 %v1953_v36, %v1025_v21  ;;  %v2889_v7 = vadd.f32 2.0, %v931_v53  ;;  %v934_v38 = vmul.f32 %v1951_v32, %v870_v48  ;;  %v755_v9 = vmul.f32 1.442695, %v679_v4 }
 0x12f   :  { %v1957_v24 = vpop.eup %1956  ;;  %v1505_v59 = vsel %vm1441_vm15, %v3776_v56, %v1377_v63  ;;  %1966 = vrcp.f32 %v2887_v40  ;;  %v2894_v17 = vadd.f32 2.0, %v963_v50  ;;  %v902_v56 = vadd.f32 2.0, %v1955_v19 }
 0x130   :  { %v1959_v62 = vpop.eup %1958  ;;  %1569 = vst.msk [vmem:[%s3732_s3 + $0x30] sm:$0xff] %vm89_vm0, %v1505_v59  ;;  %v1217_v21 = vsub.f32 2.0, %v1153_v54  ;;  %1968 = vrcp.f32 %v2889_v7  ;;  %v2902_v2 = vadd.f32 2.0, %v934_v38  ;;  %v869_v20 = vadd.f32 2.0, %v1957_v24  ;;  %v2912_v54 = vpop.f32.mrb[30].mxu0 }
 0x131   :  { %1970 = vrcp.f32 %v2894_v17  ;;  %v901_v30 = vadd.f32 2.0, %v1959_v62  ;;  %v1345_v4 = vmul.f32 %v2833_v10, %v3779_v52  ;;  %v819_v32 = vmul.f32 1.442695, %v711_v47  ;;  %v1961_v61 = vpop.eup %1960  ;;  %3780 = vst [vmem:[#allocation2_spill] sm:$0xff] %v2912_v54  ;;  %v2914_v59 = vpop.f32.mrb[30].mxu1  ;;  %v3782_v10 = vld [vmem:[#allocation11_spill] sm:$0xff] }
 0x132   :  { %v1281_v12 = vmul.f32 %v1953_v36, %v1217_v21  ;;  %1972 = vrcp.f32 %v2902_v2  ;;  %v966_v8 = vmul.f32 %v1955_v19, %v902_v56  ;;  %v2908_v48 = vmul.f32 %v1957_v24, %v869_v20  ;;  %3781 = vst [vmem:[#allocation9_spill] sm:$0xff] %v2914_v59 }
 0x133   :  { %v2910_v63 = vmul.f32 %v1959_v62, %v901_v30  ;;  %1974 = vpow2.f32 %v755_v9  ;;  %v872_v36 = vadd.f32 2.0, %v1961_v61  ;;  %v2918_v21 = vadd.f32 %v3782_v10, %v2429_v6  ;;  %v2952_v10 = vpop.f32.mrb[31].mxu1 }
 0x134   :  { %v1409_v22 = vmul.f32 %v1345_v4, %v1281_v12  ;;  %1976 = vpow2.f32 %v819_v32  ;;  %v2922_v24 = vadd.f32 2.0, %v966_v8  ;;  %v2925_v9 = vadd.f32 2.0, %v2908_v48  ;;  %v2950_v32 = vpop.f32.mrb[31].mxu0  ;;  %3785 = vst [vmem:[#allocation10_spill] sm:$0xff] %v2952_v10 }
 0x135   :  { %v1316_v56 = vmul.f32 %v2860_v3, %v2617_v31  ;;  %v1348_v20 = vmul.f32 %v964_v41, %v2793_v14  ;;  %v2934_v30 = vadd.f32 2.0, %v2910_v63  ;;  %v2941_v12 = vmul.f32 %v1961_v61, %v872_v36  ;;  %v3783_v41 = vld [vmem:[#allocation12_spill] sm:$0xff]  ;;  %3784 = vst [vmem:[#allocation3_spill] sm:$0xff] %v2950_v32 }
 0x136   :  { %v1963_v29 = vpop.eup %1962  ;;  %v1537_v62 = vsel %vm1473_vm1, %v3779_v52, %v1409_v22  ;;  %1978 = vrcp.f32 %v2922_v24  ;;  %v1315_v22 = vmul.f32 %v931_v53, %v2797_v45  ;;  %v682_v3 = vmin.f32 %v2918_v21, 20.0 }
 0x137   :  { %v1965_v47 = vpop.eup %1964  ;;  %v1124_v19 = vmul.f32 %v1963_v29, %v2871_v0  ;;  %1601 = vst.msk [vmem:[%s3732_s3 + $0x130] sm:$0xff] %vm89_vm0, %v1537_v62  ;;  %1980 = vrcp.f32 %v2925_v9  ;;  %v2948_v52 = vadd.f32 %v3783_v41, %v2429_v6  ;;  %v1347_v61 = vmul.f32 %v963_v50, %v2804_v16 }
 0x138   :  { %v904_v4 = vadd.f32 2.0, %v1965_v47  ;;  %1982 = vrcp.f32 %v2934_v30  ;;  %v2958_v53 = vadd.f32 2.0, %v2941_v12  ;;  %v1318_v41 = vmul.f32 %v934_v38, %v2808_v28 }
 0x139   :  { %v1188_v0 = vsub.f32 2.0, %v1124_v19  ;;  %v1967_v19 = vpop.eup %1966  ;;  %v761_v10 = vmul.f32 1.442695, %v682_v3  ;;  %v714_v50 = vmin.f32 %v2948_v52, 20.0  ;;  %v2972_v38 = vmul.f32 %v966_v8, %v2827_v49 }
 0x13a   :  { %v1969_v36 = vpop.eup %1968  ;;  %v1156_v59 = vmul.f32 %v1967_v19, %v2887_v40  ;;  %v2963_v32 = vmul.f32 %v1965_v47, %v904_v4  ;;  %1984 = vrcp.f32 %v2958_v53  ;;  %vm1480_vm11 = vcmp.gt.f32.partialorder %v2853_v44, 20.0 }
 0x13b   :  { %v1252_v62 = vmul.f32 %v1963_v29, %v1188_v0  ;;  %v1971_v29 = vpop.eup %1970  ;;  %v1123_v54 = vmul.f32 %v1969_v36, %v2889_v7  ;;  %1986 = vpow2.f32 %v761_v10  ;;  %v825_v37 = vmul.f32 1.442695, %v714_v50 }
 0x13c   :  { %v1973_v51 = vpop.eup %1972  ;;  %v1220_v15 = vsub.f32 2.0, %v1156_v59  ;;  %v1155_v40 = vmul.f32 %v1971_v29, %v2894_v17  ;;  %v2975_v47 = vadd.f32 2.0, %v2963_v32  ;;  %vm1447_vm12 = vcmp.gt.f32.partialorder %v2865_v25, 20.0 }
 0x13d   :  { %v1380_v0 = vmul.f32 %v1316_v56, %v1252_v62  ;;  %v1975_v56 = vpop.eup %1974  ;;  %v1187_v4 = vsub.f32 2.0, %v1123_v54  ;;  %v1126_v3 = vmul.f32 %v1973_v51, %v2902_v2  ;;  %v3786_v2 = vld [vmem:[#allocation13_spill] sm:$0xff]  ;;  %vm1479_vm13 = vcmp.gt.f32.partialorder %v2882_v39, 20.0 }
 0x13e   :  { %v1977_v59 = vpop.eup %1976  ;;  %v1284_v17 = vmul.f32 %v1967_v19, %v1220_v15  ;;  %v1219_v8 = vsub.f32 2.0, %v1155_v40  ;;  %1988 = vrcp.f32 %v2975_v47  ;;  %v871_v62 = vadd.f32 2.0, %v1975_v56 }
 0x13f   :  { %v1508_v7 = vsel %vm1444_vm2, %v2617_v31, %v1380_v0  ;;  %v1251_v5 = vmul.f32 %v1969_v36, %v1187_v4  ;;  %v1190_v13 = vsub.f32 2.0, %v1126_v3  ;;  %v903_v55 = vadd.f32 2.0, %v1977_v59  ;;  %v3787_v4 = vld [vmem:[#allocation14_spill] sm:$0xff] }
 0x140   :  { %1572 = vst.msk [vmem:[%s3732_s3 + $0x48] sm:$0xff] %vm89_vm0, %v1508_v7  ;;  %v1412_v31 = vmul.f32 %v1348_v20, %v1284_v17  ;;  %v1283_v54 = vmul.f32 %v1971_v29, %v1219_v8  ;;  %v2986_v0 = vmul.f32 %v1975_v56, %v871_v62  ;;  %v2990_v10 = vadd.f32 %v2429_v6, %v3786_v2  ;;  %v1979_v46 = vpop.eup %1978 }
 0x141   :  { %v1379_v60 = vmul.f32 %v1315_v22, %v1251_v5  ;;  %v1254_v7 = vmul.f32 %v1973_v51, %v1190_v13  ;;  %v2993_v15 = vmul.f32 %v1977_v59, %v903_v55  ;;  %1990 = vpow2.f32 %v825_v37  ;;  %v1981_v19 = vpop.eup %1980 }
 0x142   :  { %v1540_v20 = vsel %vm1476_vm3, %v2793_v14, %v1412_v31  ;;  %v1411_v36 = vmul.f32 %v1347_v61, %v1283_v54  ;;  %v1158_v29 = vmul.f32 %v1979_v46, %v2922_v24  ;;  %v3001_v6 = vadd.f32 2.0, %v2986_v0  ;;  %v1983_v5 = vpop.eup %1982 }
 0x143   :  { %1604 = vst.msk [vmem:[%s3732_s3 + $0x148] sm:$0xff] %vm89_vm0, %v1540_v20  ;;  %v1507_v37 = vsel %vm1443_vm4, %v2797_v45, %v1379_v60  ;;  %v1382_v55 = vmul.f32 %v1318_v41, %v1254_v7  ;;  %v1125_v13 = vmul.f32 %v1981_v19, %v2925_v9  ;;  %v1317_v14 = vmul.f32 %v2908_v48, %v2831_v58 }
 0x144   :  { %1571 = vst.msk [vmem:[%s3732_s3 + $0x40] sm:$0xff] %vm89_vm0, %v1507_v37  ;;  %v1539_v51 = vsel %vm1475_vm5, %v2804_v16, %v1411_v36  ;;  %v1222_v24 = vsub.f32 2.0, %v1158_v29  ;;  %v1157_v60 = vmul.f32 %v1983_v5, %v2934_v30  ;;  %1992 = vrcp.f32 %v3001_v6  ;;  %v1985_v45 = vpop.eup %1984 }
 0x145   :  { %1603 = vst.msk [vmem:[%s3732_s3 + $0x140] sm:$0xff] %vm89_vm0, %v1539_v51  ;;  %v1510_v48 = vsel %vm1446_vm6, %v2808_v28, %v1382_v55  ;;  %v1189_v9 = vsub.f32 2.0, %v1125_v13  ;;  %v1349_v22 = vmul.f32 %v2910_v63, %v2837_v18  ;;  %v1031_v16 = vadd.f32 2.0, %v2993_v15  ;;  %v1987_v40 = vpop.eup %1986  ;;  %v3044_v63 = vld [vmem:[%s3731_s2] ss:$0 sm:$0xff] }
 0x146   :  { %1574 = vst.msk [vmem:[%s3732_s3 + $0x58] sm:$0xff] %vm89_vm0, %v1510_v48  ;;  %v1286_v30 = vmul.f32 %v1979_v46, %v1222_v24  ;;  %v1221_v61 = vsub.f32 2.0, %v1157_v60  ;;  %v1128_v41 = vmul.f32 %v1985_v45, %v2958_v53  ;;  %v681_v50 = vmin.f32 %v2990_v10, 20.0  ;;  %v3789_v60 = vld [vmem:[#allocation16_spill] sm:$0xff] }
 0x147   :  { %v1253_v56 = vmul.f32 %v1981_v19, %v1189_v9  ;;  %v1320_v28 = vmul.f32 %v2941_v12, %v2849_v11  ;;  %1994 = vrcp.f32 %v1031_v16  ;;  %v3048_v3 = vadd.f32 %v3044_v63, %v3787_v4 }
 0x148   :  { %v1989_v46 = vpop.eup %1988  ;;  %v1414_v53 = vmul.f32 %v2972_v38, %v1286_v30  ;;  %v1285_v59 = vmul.f32 %v1983_v5, %v1221_v61  ;;  %v1192_v17 = vsub.f32 2.0, %v1128_v41  ;;  %v874_v8 = vadd.f32 2.0, %v1987_v40 }
 0x149   :  { %v1381_v62 = vmul.f32 %v1317_v14, %v1253_v56  ;;  %v1160_v31 = vmul.f32 %v1989_v46, %v2975_v47  ;;  %v759_v12 = vmul.f32 1.442695, %v681_v50  ;;  %v713_v54 = vmin.f32 %v3048_v3, 20.0 }
 0x14a   :  { %v1542_v2 = vsel %vm1478_vm7, %v2827_v49, %v1414_v53  ;;  %v1413_v7 = vmul.f32 %v1349_v22, %v1285_v59  ;;  %v1256_v19 = vmul.f32 %v1985_v45, %v1192_v17  ;;  %v3056_v20 = vmul.f32 %v1987_v40, %v874_v8 }
 0x14b   :  { %v1991_v36 = vpop.eup %1990  ;;  %1606 = vst.msk [vmem:[%s3732_s3 + $0x158] sm:$0xff] %vm89_vm0, %v1542_v2  ;;  %v1509_v38 = vsel %vm1445_vm8, %v2831_v58, %v1381_v62  ;;  %v1224_v47 = vsub.f32 2.0, %v1160_v31  ;;  %1996 = vpow2.f32 %v759_v12  ;;  %v823_v29 = vmul.f32 1.442695, %v713_v54  ;;  %v3792_v31 = vld [vmem:[#allocation19_spill] sm:$0xff] }
 0x14c   :  { %1573 = vst.msk [vmem:[%s3732_s3 + $0x50] sm:$0xff] %vm89_vm0, %v1509_v38  ;;  %v1541_v49 = vsel %vm1477_vm9, %v2837_v18, %v1413_v7  ;;  %v1384_v5 = vmul.f32 %v1320_v28, %v1256_v19  ;;  %v1002_v37 = vadd.f32 2.0, %v3056_v20  ;;  %v1352_v55 = vmul.f32 %v2963_v32, %v2853_v44  ;;  %v3788_v18 = vld [vmem:[#allocation15_spill] sm:$0xff] }
 0x14d   :  { %1605 = vst.msk [vmem:[%s3732_s3 + $0x150] sm:$0xff] %vm89_vm0, %v1541_v49  ;;  %v1288_v58 = vmul.f32 %v1989_v46, %v1224_v47  ;;  %v906_v13 = vadd.f32 2.0, %v1991_v36  ;;  %1998 = vpow2.f32 %v823_v29  ;;  %v3083_v24 = vadd.f32 %v3044_v63, %v3788_v18  ;;  %v3793_v49 = vld [vmem:[#allocation20_spill] sm:$0xff] }
 0x14e   :  { %v1993_v14 = vpop.eup %1992  ;;  %v1512_v51 = vsel %vm1448_vm10, %v2849_v11, %v1384_v5  ;;  %2000 = vrcp.f32 %v1002_v37  ;;  %v3087_v45 = vadd.f32 %v3044_v63, %v3789_v60  ;;  %v3790_v11 = vld [vmem:[#allocation17_spill] sm:$0xff]  ;;  %v1319_v59 = vmul.f32 %v2986_v0, %v2865_v25 }
 0x14f   :  { %1576 = vst.msk [vmem:[%s3732_s3 + $0x68] sm:$0xff] %vm89_vm0, %v1512_v51  ;;  %v1416_v32 = vmul.f32 %v1352_v55, %v1288_v58  ;;  %v1127_v48 = vmul.f32 %v1993_v14, %v3001_v6  ;;  %v3094_v9 = vmul.f32 %v1991_v36, %v906_v13  ;;  %v3098_v22 = vadd.f32 %v3044_v63, %v3790_v11 }
 0x150   :  { %v684_v30 = vmin.f32 %v3083_v24, 20.0  ;;  %v716_v61 = vmin.f32 %v3087_v45, 20.0  ;;  %v3119_v12 = vadd.f32 %v3044_v63, %v3792_v31  ;;  %v1351_v2 = vmul.f32 %v2993_v15, %v2882_v39 }
 0x151   :  { %v1995_v41 = vpop.eup %1994  ;;  %v1544_v50 = vsel %vm1480_vm11, %v2853_v44, %v1416_v32  ;;  %v1191_v40 = vsub.f32 2.0, %v1127_v48  ;;  %v1034_v6 = vadd.f32 2.0, %v3094_v9  ;;  %v683_v46 = vmin.f32 %v3098_v22, 20.0  ;;  %v3791_v44 = vld [vmem:[#allocation18_spill] sm:$0xff] }
 0x152   :  { %1608 = vst.msk [vmem:[%s3732_s3 + $0x168] sm:$0xff] %vm89_vm0, %v1544_v50  ;;  %v1159_v56 = vmul.f32 %v1995_v41, %v1031_v16  ;;  %v765_v28 = vmul.f32 1.442695, %v684_v30  ;;  %v829_v4 = vmul.f32 1.442695, %v716_v61  ;;  %v3115_v17 = vadd.f32 %v3044_v63, %v3791_v44  ;;  %v3794_v30 = vld [vmem:[#allocation21_spill] sm:$0xff] }
 0x153   :  { %v1255_v53 = vmul.f32 %v1993_v14, %v1191_v40  ;;  %2002 = vrcp.f32 %v1034_v6  ;;  %v763_v62 = vmul.f32 1.442695, %v683_v46  ;;  %v686_v36 = vmin.f32 %v3119_v12, 20.0 }
 0x154   :  { %v1223_v8 = vsub.f32 2.0, %v1159_v56  ;;  %2004 = vpow2.f32 %v765_v28  ;;  %v715_v0 = vmin.f32 %v3115_v17, 20.0  ;;  %v3130_v5 = vadd.f32 %v3044_v63, %v3793_v49 }
 0x155   :  { %v1997_v16 = vpop.eup %1996  ;;  %v1383_v54 = vmul.f32 %v1319_v59, %v1255_v53  ;;  %2006 = vpow2.f32 %v829_v4  ;;  %v769_v14 = vmul.f32 1.442695, %v686_v36  ;;  %v1322_v56 = vmul.f32 %v3056_v20, %v2918_v21 }
 0x156   :  { %v1287_v7 = vmul.f32 %v1995_v41, %v1223_v8  ;;  %v873_v19 = vadd.f32 2.0, %v1997_v16  ;;  %2008 = vpow2.f32 %v763_v62  ;;  %v827_v29 = vmul.f32 1.442695, %v715_v0 }
 0x157   :  { %v1999_v38 = vpop.eup %1998  ;;  %v1511_v47 = vsel %vm1447_vm12, %v2865_v25, %v1383_v54  ;;  %v718_v25 = vmin.f32 %v3130_v5, 20.0  ;;  %vm1450_vm14 = vcmp.gt.f32.partialorder %v2918_v21, 20.0  ;;  %v3164_v31 = vadd.f32 %v3044_v63, %v2644_v27 }
 0x158   :  { %v2001_v58 = vpop.eup %2000  ;;  %1575 = vst.msk [vmem:[%s3732_s3 + $0x60] sm:$0xff] %vm89_vm0, %v1511_v47  ;;  %v1415_v15 = vmul.f32 %v1351_v2, %v1287_v7  ;;  %v3136_v55 = vmul.f32 %v1997_v16, %v873_v19  ;;  %v905_v13 = vadd.f32 2.0, %v1999_v38  ;;  %2010 = vpow2.f32 %v827_v29 }
 0x159   :  { %v1130_v51 = vmul.f32 %v2001_v58, %v1002_v37  ;;  %2012 = vpow2.f32 %v769_v14  ;;  %v833_v11 = vmul.f32 1.442695, %v718_v25  ;;  %v3150_v37 = vadd.f32 %v3044_v63, %v3794_v30 }
 0x15a   :  { %v1543_v18 = vsel %vm1479_vm13, %v2882_v39, %v1415_v15  ;;  %v1001_v60 = vadd.f32 2.0, %v3136_v55  ;;  %v3142_v32 = vmul.f32 %v1999_v38, %v905_v13  ;;  %v3795_v39 = vld [vmem:[#allocation22_spill] sm:$0xff]  ;;  %v1354_v54 = vmul.f32 %v3094_v9, %v2948_v52 }
 0x15b   :  { %1607 = vst.msk [vmem:[%s3732_s3 + $0x160] sm:$0xff] %vm89_vm0, %v1543_v18  ;;  %v1194_v48 = vsub.f32 2.0, %v1130_v51  ;;  %v3155_v41 = vadd.f32 %v3044_v63, %v3795_v39  ;;  %v685_v28 = vmin.f32 %v3150_v37, 20.0  ;;  %v688_v38 = vmin.f32 %v3164_v31, 20.0 }
 0x15c   :  { %2014 = vrcp.f32 %v1001_v60  ;;  %v1033_v61 = vadd.f32 2.0, %v3142_v32  ;;  %vm1482_vm15 = vcmp.gt.f32.partialorder %v2948_v52, 20.0  ;;  %vm1449_vm1 = vcmp.gt.f32.partialorder %v2990_v10, 20.0 }
 0x15d   :  { %v2003_v50 = vpop.eup %2002  ;;  %v1258_v40 = vmul.f32 %v2001_v58, %v1194_v48  ;;  %2016 = vpow2.f32 %v833_v11  ;;  %v717_v53 = vmin.f32 %v3155_v41, 20.0  ;;  %v767_v62 = vmul.f32 1.442695, %v685_v28 }
 0x15e   :  { %v2005_v4 = vpop.eup %2004  ;;  %v1162_v46 = vmul.f32 %v2003_v50, %v1034_v6  ;;  %2018 = vrcp.f32 %v1033_v61  ;;  %v773_v51 = vmul.f32 1.442695, %v688_v38  ;;  %vm1481_vm2 = vcmp.gt.f32.partialorder %v3048_v3, 20.0 }
 0x15f   :  { %v2007_v59 = vpop.eup %2006  ;;  %v1386_v44 = vmul.f32 %v1322_v56, %v1258_v40  ;;  %v876_v8 = vadd.f32 2.0, %v2005_v4  ;;  %v831_v0 = vmul.f32 1.442695, %v717_v53  ;;  %2020 = vpow2.f32 %v767_v62 }
 0x160   :  { %v2009_v16 = vpop.eup %2008  ;;  %v1226_v20 = vsub.f32 2.0, %v1162_v46  ;;  %v908_v2 = vadd.f32 2.0, %v2007_v59  ;;  %vm1452_vm3 = vcmp.gt.f32.partialorder %v3083_v24, 20.0  ;;  %vm1484_vm4 = vcmp.gt.f32.partialorder %v3087_v45, 20.0 }
 0x161   :  { %v1514_v6 = vsel %vm1450_vm14, %v2918_v21, %v1386_v44  ;;  %v3169_v7 = vmul.f32 %v2005_v4, %v876_v8  ;;  %v875_v19 = vadd.f32 2.0, %v2009_v16  ;;  %2022 = vpow2.f32 %v831_v0 }
 0x162   :  { %1578 = vst.msk [vmem:[%s3732_s3 + $0x78] sm:$0xff] %vm89_vm0, %v1514_v6  ;;  %v1290_v27 = vmul.f32 %v2003_v50, %v1226_v20  ;;  %v3175_v36 = vmul.f32 %v2007_v59, %v908_v2  ;;  %v2011_v9 = vpop.eup %2010  ;;  %v3183_v21 = vadd.f32 %v3044_v63, %v2646_v43  ;;  %v1353_v20 = vmul.f32 %v3142_v32, %v3048_v3 }
 0x163   :  { %v1004_v47 = vadd.f32 2.0, %v3169_v7  ;;  %v3179_v29 = vmul.f32 %v2009_v16, %v875_v19  ;;  %v907_v15 = vadd.f32 2.0, %v2011_v9  ;;  %v2013_v13 = vpop.eup %2012  ;;  %v3218_v16 = vadd.f32 %v3044_v63, %v2650_v57 }
 0x164   :  { %v1418_v49 = vmul.f32 %v1354_v54, %v1290_v27  ;;  %v3186_v58 = vadd.f32 2.0, %v3175_v36  ;;  %v878_v48 = vadd.f32 2.0, %v2013_v13  ;;  %v720_v39 = vmin.f32 %v3183_v21, 20.0 }
 0x165   :  { %2024 = vrcp.f32 %v1004_v47  ;;  %v3190_v14 = vadd.f32 2.0, %v3179_v29  ;;  %v3194_v43 = vmul.f32 %v2011_v9, %v907_v15  ;;  %v687_v19 = vmin.f32 %v3218_v16, 20.0 }
 0x166   :  { %v2015_v25 = vpop.eup %2014  ;;  %v1546_v18 = vsel %vm1482_vm15, %v2948_v52, %v1418_v49  ;;  %2026 = vrcp.f32 %v3186_v58  ;;  %v3206_v40 = vmul.f32 %v2013_v13, %v878_v48  ;;  %v837_v46 = vmul.f32 1.442695, %v720_v39 }
 0x167   :  { %v2017_v11 = vpop.eup %2016  ;;  %1610 = vst.msk [vmem:[%s3732_s3 + $0x178] sm:$0xff] %vm89_vm0, %v1546_v18  ;;  %v1129_v30 = vmul.f32 %v2015_v25, %v1001_v60  ;;  %2028 = vrcp.f32 %v3190_v14  ;;  %v3204_v52 = vadd.f32 2.0, %v3194_v43  ;;  %v1321_v60 = vmul.f32 %v3136_v55, %v2990_v10 }
 0x168   :  { %v2019_v50 = vpop.eup %2018  ;;  %v910_v56 = vadd.f32 2.0, %v2017_v11  ;;  %2030 = vpow2.f32 %v773_v51  ;;  %v3212_v53 = vadd.f32 2.0, %v3206_v40  ;;  %v3233_v32 = vadd.f32 %v3044_v63, %v2652_v26 }
 0x169   :  { %v1193_v28 = vsub.f32 2.0, %v1129_v30  ;;  %v1161_v4 = vmul.f32 %v2019_v50, %v1033_v61  ;;  %2032 = vrcp.f32 %v3204_v52  ;;  %v2021_v44 = vpop.eup %2020  ;;  %v1324_v49 = vmul.f32 %v3169_v7, %v3083_v24 }
 0x16a   :  { %v3214_v59 = vmul.f32 %v2017_v11, %v910_v56  ;;  %2034 = vpow2.f32 %v837_v46  ;;  %v877_v54 = vadd.f32 2.0, %v2021_v44  ;;  %v1356_v11 = vmul.f32 %v3175_v36, %v3087_v45 }
 0x16b   :  { %v1257_v8 = vmul.f32 %v2015_v25, %v1193_v28  ;;  %v1225_v62 = vsub.f32 2.0, %v1161_v4  ;;  %v2023_v61 = vpop.eup %2022  ;;  %2036 = vrcp.f32 %v3212_v53  ;;  %v719_v25 = vmin.f32 %v3233_v32, 20.0 }
 0x16c   :  { %v3224_v55 = vadd.f32 2.0, %v3214_v59  ;;  %v909_v6 = vadd.f32 2.0, %v2023_v61  ;;  %v3229_v57 = vmul.f32 %v2021_v44, %v877_v54  ;;  %vm1451_vm5 = vcmp.gt.f32.partialorder %v3098_v22, 20.0 }
 0x16d   :  { %v1385_v2 = vmul.f32 %v1321_v60, %v1257_v8  ;;  %v1289_v0 = vmul.f32 %v2019_v50, %v1225_v62  ;;  %v1323_v36 = vmul.f32 %v3179_v29, %v3098_v22  ;;  %v3273_v56 = vadd.f32 %v3044_v63, %v2673_v1 }
 0x16e   :  { %2038 = vrcp.f32 %v3224_v55  ;;  %v3241_v15 = vmul.f32 %v2023_v61, %v909_v6  ;;  %v3249_v51 = vadd.f32 2.0, %v3229_v57  ;;  %vm1483_vm6 = vcmp.gt.f32.partialorder %v3115_v17, 20.0 }
 0x16f   :  { %v2025_v27 = vpop.eup %2024  ;;  %v1513_v38 = vsel %vm1449_vm1, %v2990_v10, %v1385_v2  ;;  %v1417_v9 = vmul.f32 %v1353_v20, %v1289_v0  ;;  %v771_v10 = vmul.f32 1.442695, %v687_v19  ;;  %v690_v29 = vmin.f32 %v3273_v56, 20.0 }
 0x170   :  { %v2027_v13 = vpop.eup %2026  ;;  %1577 = vst.msk [vmem:[%s3732_s3 + $0x70] sm:$0xff] %vm89_vm0, %v1513_v38  ;;  %v1132_v26 = vmul.f32 %v2025_v27, %v1004_v47  ;;  %v3260_v47 = vadd.f32 2.0, %v3241_v15  ;;  %2040 = vrcp.f32 %v3249_v51  ;;  %vm1454_vm7 = vcmp.gt.f32.partialorder %v3119_v12, 20.0 }
 0x171   :  { %v2029_v7 = vpop.eup %2028  ;;  %v1545_v18 = vsel %vm1481_vm2, %v3048_v3, %v1417_v9  ;;  %v1164_v48 = vmul.f32 %v2027_v13, %v3186_v58  ;;  %v835_v3 = vmul.f32 1.442695, %v719_v25  ;;  %v777_v19 = vmul.f32 1.442695, %v690_v29 }
 0x172   :  { %1609 = vst.msk [vmem:[%s3732_s3 + $0x170] sm:$0xff] %vm89_vm0, %v1545_v18  ;;  %v1196_v30 = vsub.f32 2.0, %v1132_v26  ;;  %v1131_v39 = vmul.f32 %v2029_v7, %v3190_v14  ;;  %v2031_v58 = vpop.eup %2030  ;;  %2042 = vrcp.f32 %v3260_v47  ;;  %v1355_v9 = vmul.f32 %v3194_v43, %v3115_v17 }
 0x173   :  { %v1228_v50 = vsub.f32 2.0, %v1164_v48  ;;  %v2033_v28 = vpop.eup %2032  ;;  %v880_v14 = vadd.f32 2.0, %v2031_v58  ;;  %2044 = vpow2.f32 %v771_v10  ;;  %vm1486_vm8 = vcmp.gt.f32.partialorder %v3130_v5, 20.0 }
 0x174   :  { %v1260_v4 = vmul.f32 %v2025_v27, %v1196_v30  ;;  %v1195_v46 = vsub.f32 2.0, %v1131_v39  ;;  %v2035_v60 = vpop.eup %2034  ;;  %v1163_v8 = vmul.f32 %v2033_v28, %v3204_v52  ;;  %2046 = vpow2.f32 %v835_v3 }
 0x175   :  { %v1292_v44 = vmul.f32 %v2027_v13, %v1228_v50  ;;  %v2037_v62 = vpop.eup %2036  ;;  %v3279_v1 = vmul.f32 %v2031_v58, %v880_v14  ;;  %v912_v54 = vadd.f32 2.0, %v2035_v60  ;;  %v1326_v10 = vmul.f32 %v3206_v40, %v3119_v12 }
 0x176   :  { %v1388_v61 = vmul.f32 %v1324_v49, %v1260_v4  ;;  %v1259_v20 = vmul.f32 %v2029_v7, %v1195_v46  ;;  %v1227_v0 = vsub.f32 2.0, %v1163_v8  ;;  %v1134_v6 = vmul.f32 %v2037_v62, %v3212_v53 }
 0x177   :  { %v1420_v2 = vmul.f32 %v1356_v11, %v1292_v44  ;;  %v3289_v49 = vadd.f32 2.0, %v3279_v1  ;;  %v3309_v25 = vmul.f32 %v2035_v60, %v912_v54  ;;  %v3320_v40 = vadd.f32 %v3044_v63, %v2675_v33 }
 0x178   :  { %v2039_v27 = vpop.eup %2038  ;;  %v1516_v52 = vsel %vm1452_vm3, %v3083_v24, %v1388_v61  ;;  %v1387_v38 = vmul.f32 %v1323_v36, %v1259_v20  ;;  %v1291_v13 = vmul.f32 %v2033_v28, %v1227_v0  ;;  %v1198_v24 = vsub.f32 2.0, %v1134_v6 }
 0x179   :  { %1580 = vst.msk [vmem:[%s3732_s3 + $0x88] sm:$0xff] %vm89_vm0, %v1516_v52  ;;  %v1548_v53 = vsel %vm1484_vm4, %v3087_v45, %v1420_v2  ;;  %v1166_v26 = vmul.f32 %v2039_v27, %v3224_v55  ;;  %2048 = vrcp.f32 %v3289_v49  ;;  %v1040_v48 = vadd.f32 2.0, %v3309_v25 }
 0x17a   :  { %1612 = vst.msk [vmem:[%s3732_s3 + $0x188] sm:$0xff] %vm89_vm0, %v1548_v53  ;;  %v1515_v43 = vsel %vm1451_vm5, %v3098_v22, %v1387_v38  ;;  %v1419_v45 = vmul.f32 %v1355_v9, %v1291_v13  ;;  %v1262_v55 = vmul.f32 %v2037_v62, %v1198_v24  ;;  %2050 = vpow2.f32 %v777_v19  ;;  %v2041_v18 = vpop.eup %2040 }
 0x17b   :  { %1579 = vst.msk [vmem:[%s3732_s3 + $0x80] sm:$0xff] %vm89_vm0, %v1515_v43  ;;  %v1230_v7 = vsub.f32 2.0, %v1166_v26  ;;  %v1358_v22 = vmul.f32 %v3214_v59, %v3130_v5  ;;  %v3324_v11 = vadd.f32 %v3044_v63, %v2687_v42  ;;  %v1133_v50 = vmul.f32 %v2041_v18, %v3249_v51  ;;  %v3796_v43 = vld [vmem:[#allocation23_spill] sm:$0xff] }
 0x17c   :  { %v2043_v30 = vpop.eup %2042  ;;  %v1547_v39 = vsel %vm1483_vm6, %v3115_v17, %v1419_v45  ;;  %v1390_v3 = vmul.f32 %v1326_v10, %v1262_v55  ;;  %v1325_v33 = vmul.f32 %v3229_v57, %v3150_v37  ;;  %2052 = vrcp.f32 %v1040_v48 }
 0x17d   :  { %v1294_v58 = vmul.f32 %v2039_v27, %v1230_v7  ;;  %v2045_v59 = vpop.eup %2044  ;;  %1611 = vst.msk [vmem:[%s3732_s3 + $0x180] sm:$0xff] %vm89_vm0, %v1547_v39  ;;  %v1165_v42 = vmul.f32 %v2043_v30, %v3260_v47  ;;  %v722_v36 = vmin.f32 %v3320_v40, 20.0  ;;  %v1197_v4 = vsub.f32 2.0, %v1133_v50 }
 0x17e   :  { %v2047_v28 = vpop.eup %2046  ;;  %v1518_v17 = vsel %vm1454_vm7, %v3119_v12, %v1390_v3  ;;  %v879_v46 = vadd.f32 2.0, %v2045_v59  ;;  %v689_v47 = vmin.f32 %v3324_v11, 20.0  ;;  %v1357_v12 = vmul.f32 %v3241_v15, %v3155_v41  ;;  %v3798_v3 = vld [vmem:[#allocation25_spill] sm:$0xff] }
 0x17f   :  { %v1422_v51 = vmul.f32 %v1358_v22, %v1294_v58  ;;  %1582 = vst.msk [vmem:[%s3732_s3 + $0x98] sm:$0xff] %vm89_vm0, %v1518_v17  ;;  %v1229_v14 = vsub.f32 2.0, %v1165_v42  ;;  %v911_v57 = vadd.f32 2.0, %v2047_v28  ;;  %v841_v60 = vmul.f32 1.442695, %v722_v36 }
 0x180   :  { %v1261_v8 = vmul.f32 %v2041_v18, %v1197_v4  ;;  %v3351_v29 = vmul.f32 %v2045_v59, %v879_v46  ;;  %v775_v20 = vmul.f32 1.442695, %v689_v47  ;;  %vm1453_vm9 = vcmp.gt.f32.partialorder %v3150_v37, 20.0  ;;  %v3797_v18 = vld [vmem:[#allocation24_spill] sm:$0xff] }
 0x181   :  { %v1550_v44 = vsel %vm1486_vm8, %v3130_v5, %v1422_v51  ;;  %v1293_v62 = vmul.f32 %v2043_v30, %v1229_v14  ;;  %v3357_v61 = vmul.f32 %v2047_v28, %v911_v57  ;;  %2054 = vpow2.f32 %v841_v60 }
 0x182   :  { %1614 = vst.msk [vmem:[%s3732_s3 + $0x198] sm:$0xff] %vm89_vm0, %v1550_v44  ;;  %v1389_v54 = vmul.f32 %v1325_v33, %v1261_v8  ;;  %v1007_v5 = vadd.f32 2.0, %v3351_v29  ;;  %v3363_v15 = vadd.f32 %v3044_v63, %v2689_v35  ;;  %vm1485_vm10 = vcmp.gt.f32.partialorder %v3155_v41, 20.0 }
 0x183   :  { %v2049_v2 = vpop.eup %2048  ;;  %v1421_v0 = vmul.f32 %v1357_v12, %v1293_v62  ;;  %v1039_v6 = vadd.f32 2.0, %v3357_v61  ;;  %2056 = vpow2.f32 %v775_v20  ;;  %v3385_v13 = vadd.f32 %v3044_v63, %v2719_v34 }
 0x184   :  { %v2051_v19 = vpop.eup %2050  ;;  %v1517_v27 = vsel %vm1453_vm9, %v3150_v37, %v1389_v54  ;;  %v1136_v52 = vmul.f32 %v2049_v2, %v3289_v49  ;;  %2058 = vrcp.f32 %v1007_v5  ;;  %v721_v38 = vmin.f32 %v3363_v15, 20.0 }
 0x185   :  { %1581 = vst.msk [vmem:[%s3732_s3 + $0x90] sm:$0xff] %vm89_vm0, %v1517_v27  ;;  %v1549_v35 = vsel %vm1485_vm10, %v3155_v41, %v1421_v0  ;;  %2060 = vrcp.f32 %v1039_v6  ;;  %v882_v9 = vadd.f32 2.0, %v2051_v19  ;;  %v3381_v49 = vadd.f32 %v3044_v63, %v2717_v23 }
 0x186   :  { %1613 = vst.msk [vmem:[%s3732_s3 + $0x190] sm:$0xff] %vm89_vm0, %v1549_v35  ;;  %v1200_v37 = vsub.f32 2.0, %v1136_v52  ;;  %v839_v53 = vmul.f32 1.442695, %v721_v38  ;;  %v2053_v24 = vpop.eup %2052  ;;  %v1328_v41 = vmul.f32 %v3279_v1, %v3164_v31  ;;  %v3393_v10 = vadd.f32 %v3044_v63, %v3796_v43 }
 0x187   :  { %v3389_v26 = vmul.f32 %v2051_v19, %v882_v9  ;;  %v1168_v55 = vmul.f32 %v2053_v24, %v1040_v48  ;;  %v692_v23 = vmin.f32 %v3381_v49, 20.0  ;;  %vm1456_vm11 = vcmp.gt.f32.partialorder %v3164_v31, 20.0 }
 0x188   :  { %v1264_v45 = vmul.f32 %v2049_v2, %v1200_v37  ;;  %2062 = vpow2.f32 %v839_v53  ;;  %v724_v7 = vmin.f32 %v3385_v13, 20.0  ;;  %v3401_v1 = vadd.f32 %v3044_v63, %v3797_v18 }
 0x189   :  { %v1010_v34 = vadd.f32 2.0, %v3389_v26  ;;  %v1232_v30 = vsub.f32 2.0, %v1168_v55  ;;  %v781_v39 = vmul.f32 1.442695, %v692_v23  ;;  %v3405_v58 = vadd.f32 %v3044_v63, %v3798_v3 }
 0x18a   :  { %v1392_v22 = vmul.f32 %v1328_v41, %v1264_v45  ;;  %v1360_v50 = vmul.f32 %v3309_v25, %v3183_v21  ;;  %v845_v59 = vmul.f32 1.442695, %v724_v7  ;;  %v691_v33 = vmin.f32 %v3393_v10, 20.0 }
 0x18b   :  { %v2055_v48 = vpop.eup %2054  ;;  %2064 = vrcp.f32 %v1010_v34  ;;  %v1296_v36 = vmul.f32 %v2053_v24, %v1232_v30  ;;  %v723_v4 = vmin.f32 %v3401_v1, 20.0  ;;  %vm1488_vm12 = vcmp.gt.f32.partialorder %v3183_v21, 20.0 }
 0x18c   :  { %v1520_v42 = vsel %vm1456_vm11, %v3164_v31, %v1392_v22  ;;  %v914_v28 = vadd.f32 2.0, %v2055_v48  ;;  %2066 = vpow2.f32 %v781_v39  ;;  %v779_v51 = vmul.f32 1.442695, %v691_v33  ;;  %v3801_v33 = vld [vmem:[#allocation28_spill] sm:$0xff] }
 0x18d   :  { %v2057_v17 = vpop.eup %2056  ;;  %1584 = vst.msk [vmem:[%s3732_s3 + $0xa8] sm:$0xff] %vm89_vm0, %v1520_v42  ;;  %2068 = vpow2.f32 %v845_v59  ;;  %v1424_v46 = vmul.f32 %v1360_v50, %v1296_v36  ;;  %v694_v31 = vmin.f32 %v3405_v58, 20.0  ;;  %v843_v44 = vmul.f32 1.442695, %v723_v4 }
 0x18e   :  { %v2059_v25 = vpop.eup %2058  ;;  %v3416_v14 = vmul.f32 %v2055_v48, %v914_v28  ;;  %v881_v57 = vadd.f32 2.0, %v2057_v17  ;;  %2070 = vpow2.f32 %v779_v51  ;;  %v1327_v38 = vmul.f32 %v3351_v29, %v3218_v16 }
 0x18f   :  { %v2061_v60 = vpop.eup %2060  ;;  %v1135_v47 = vmul.f32 %v2059_v25, %v1007_v5  ;;  %v1552_v8 = vsel %vm1488_vm12, %v3183_v21, %v1424_v46  ;;  %2072 = vpow2.f32 %v843_v44  ;;  %v785_v2 = vmul.f32 1.442695, %v694_v31  ;;  %v3799_v5 = vld [vmem:[#allocation26_spill] sm:$0xff]  ;;  %v3800_v21 = vld [vmem:[#allocation27_spill] sm:$0xff] }
 0x190   :  { %v1167_v12 = vmul.f32 %v2061_v60, %v1039_v6  ;;  %v1042_v62 = vadd.f32 2.0, %v3416_v14  ;;  %1616 = vst.msk [vmem:[%s3732_s3 + $0x1a8] sm:$0xff] %vm89_vm0, %v1552_v8  ;;  %v3426_v54 = vmul.f32 %v2057_v17, %v881_v57  ;;  %v3430_v27 = vadd.f32 %v3044_v63, %v3799_v5 }
 0x191   :  { %v1199_v20 = vsub.f32 2.0, %v1135_v47  ;;  %v3434_v6 = vadd.f32 %v3044_v63, %v3800_v21  ;;  %v1359_v53 = vmul.f32 %v3357_v61, %v3233_v32  ;;  %vm1455_vm13 = vcmp.gt.f32.partialorder %v3218_v16, 20.0 }
 0x192   :  { %v2063_v0 = vpop.eup %2062  ;;  %v1231_v19 = vsub.f32 2.0, %v1167_v12  ;;  %2074 = vrcp.f32 %v1042_v62  ;;  %v1009_v35 = vadd.f32 2.0, %v3426_v54  ;;  %v726_v24 = vmin.f32 %v3430_v27, 20.0 }
 0x193   :  { %v1263_v52 = vmul.f32 %v2059_v25, %v1199_v20  ;;  %v913_v9 = vadd.f32 2.0, %v2063_v0  ;;  %2076 = vpow2.f32 %v785_v2  ;;  %v693_v55 = vmin.f32 %v3434_v6, 20.0 }
 0x194   :  { %v1295_v37 = vmul.f32 %v2061_v60, %v1231_v19  ;;  %2078 = vrcp.f32 %v1009_v35  ;;  %v849_v18 = vmul.f32 1.442695, %v726_v24  ;;  %vm1487_vm14 = vcmp.gt.f32.partialorder %v3233_v32, 20.0 }
 0x195   :  { %v2065_v41 = vpop.eup %2064  ;;  %v1391_v43 = vmul.f32 %v1327_v38, %v1263_v52  ;;  %v3442_v45 = vmul.f32 %v2063_v0, %v913_v9  ;;  %v783_v59 = vmul.f32 1.442695, %v693_v55  ;;  %v3462_v42 = vadd.f32 %v3044_v63, %v3801_v33  ;;  %v3803_v55 = vld [vmem:[#allocation5_spill] sm:$0xff] }
 0x196   :  { %v2067_v23 = vpop.eup %2066  ;;  %v1423_v29 = vmul.f32 %v1359_v53, %v1295_v37  ;;  %v1138_v7 = vmul.f32 %v2065_v41, %v1010_v34  ;;  %2080 = vpow2.f32 %v849_v18  ;;  %vm1458_vm15 = vcmp.gt.f32.partialorder %v3273_v56, 20.0 }
 0x197   :  { %v2069_v22 = vpop.eup %2068  ;;  %v1519_v30 = vsel %vm1455_vm13, %v3218_v16, %v1391_v43  ;;  %v1041_v61 = vadd.f32 2.0, %v3442_v45  ;;  %v884_v39 = vadd.f32 2.0, %v2067_v23  ;;  %v725_v25 = vmin.f32 %v3462_v42, 20.0 }
 0x198   :  { %1583 = vst.msk [vmem:[%s3732_s3 + $0xa0] sm:$0xff] %vm89_vm0, %v1519_v30  ;;  %v1551_v3 = vsel %vm1487_vm14, %v3233_v32, %v1423_v29  ;;  %v1202_v48 = vsub.f32 2.0, %v1138_v7  ;;  %v916_v50 = vadd.f32 2.0, %v2069_v22  ;;  %v2071_v34 = vpop.eup %2070  ;;  %v1330_v32 = vmul.f32 %v3389_v26, %v3273_v56  ;;  %v3802_v26 = vld [vmem:[#allocation4_spill] sm:$0xff] }
 0x199   :  { %1615 = vst.msk [vmem:[%s3732_s3 + $0x1a0] sm:$0xff] %vm89_vm0, %v1551_v3  ;;  %2082 = vrcp.f32 %v1041_v61  ;;  %v3458_v16 = vmul.f32 %v2067_v23, %v884_v39  ;;  %v883_v17 = vadd.f32 2.0, %v2071_v34  ;;  %v2073_v51 = vpop.eup %2072  ;;  %v3480_v47 = vadd.f32 %v3044_v63, %v3802_v26 }
 0x19a   :  { %v1266_v36 = vmul.f32 %v2065_v41, %v1202_v48  ;;  %v3466_v28 = vmul.f32 %v2069_v22, %v916_v50  ;;  %2084 = vpow2.f32 %v783_v59  ;;  %v915_v8 = vadd.f32 2.0, %v2073_v51 }
 0x19b   :  { %v3470_v4 = vadd.f32 2.0, %v3458_v16  ;;  %v3476_v60 = vmul.f32 %v2071_v34, %v883_v17  ;;  %v847_v12 = vmul.f32 1.442695, %v725_v25  ;;  %vm1490_vm1 = vcmp.gt.f32.partialorder %v3320_v40, 20.0 }
 0x19c   :  { %v2075_v46 = vpop.eup %2074  ;;  %v1394_v57 = vmul.f32 %v1330_v32, %v1266_v36  ;;  %v3474_v31 = vadd.f32 2.0, %v3466_v28  ;;  %v1362_v9 = vmul.f32 %v3416_v14, %v3320_v40  ;;  %vm1457_vm2 = vcmp.gt.f32.partialorder %v3324_v11, 20.0  ;;  %v3804_v32 = vld [vmem:[#allocation7_spill] sm:$0xff] }
 0x19d   :  { %v1170_v44 = vmul.f32 %v2075_v46, %v1042_v62  ;;  %2086 = vrcp.f32 %v3470_v4  ;;  %v2077_v20 = vpop.eup %2076  ;;  %v3486_v0 = vadd.f32 2.0, %v3476_v60  ;;  %v3492_v62 = vmul.f32 %v2073_v51, %v915_v8 }
 0x19e   :  { %v1522_v2 = vsel %vm1458_vm15, %v3273_v56, %v1394_v57  ;;  %2088 = vrcp.f32 %v3474_v31  ;;  %v2079_v19 = vpop.eup %2078  ;;  %v886_v21 = vadd.f32 2.0, %v2077_v20  ;;  %v696_v56 = vmin.f32 %v3480_v47, 20.0 }
 0x19f   :  { %1586 = vst.msk [vmem:[%s3732_s3 + $0xb8] sm:$0xff] %vm89_vm0, %v1522_v2  ;;  %v1234_v5 = vsub.f32 2.0, %v1170_v44  ;;  %2090 = vpow2.f32 %v847_v12  ;;  %v1137_v52 = vmul.f32 %v2079_v19, %v1009_v35  ;;  %v3500_v37 = vadd.f32 2.0, %v3492_v62 }
 0x1a0   :  { %2092 = vrcp.f32 %v3486_v0  ;;  %v3502_v53 = vmul.f32 %v2077_v20, %v886_v21  ;;  %v2081_v24 = vpop.eup %2080  ;;  %v789_v43 = vmul.f32 1.442695, %v696_v56  ;;  %v3507_v35 = vadd.f32 %v3044_v63, %v3803_v55 }
 0x1a1   :  { %v1298_v38 = vmul.f32 %v2075_v46, %v1234_v5  ;;  %v1201_v41 = vsub.f32 2.0, %v1137_v52  ;;  %v1329_v7 = vmul.f32 %v3426_v54, %v3324_v11  ;;  %2094 = vrcp.f32 %v3500_v37 }
 0x1a2   :  { %v3513_v14 = vadd.f32 2.0, %v3502_v53  ;;  %v918_v30 = vadd.f32 2.0, %v2081_v24  ;;  %2096 = vpow2.f32 %v789_v43  ;;  %vm1489_vm3 = vcmp.gt.f32.partialorder %v3363_v15, 20.0 }
 0x1a3   :  { %v2083_v23 = vpop.eup %2082  ;;  %v1426_v29 = vmul.f32 %v1362_v9, %v1298_v38  ;;  %v1265_v18 = vmul.f32 %v2079_v19, %v1201_v41  ;;  %v728_v54 = vmin.f32 %v3507_v35, 20.0  ;;  %v1332_v33 = vmul.f32 %v3458_v16, %v3381_v49  ;;  %v3805_v9 = vld [vmem:[#allocation8_spill] sm:$0xff] }
 0x1a4   :  { %v1169_v22 = vmul.f32 %v2083_v23, %v1041_v61  ;;  %v2085_v39 = vpop.eup %2084  ;;  %2098 = vrcp.f32 %v3513_v14  ;;  %v3525_v50 = vmul.f32 %v2081_v24, %v918_v30  ;;  %vm1460_vm4 = vcmp.gt.f32.partialorder %v3381_v49, 20.0 }
 0x1a5   :  { %v1554_v3 = vsel %vm1490_vm1, %v3320_v40, %v1426_v29  ;;  %v1393_v48 = vmul.f32 %v1329_v7, %v1265_v18  ;;  %v885_v34 = vadd.f32 2.0, %v2085_v39  ;;  %v1361_v40 = vmul.f32 %v3442_v45, %v3363_v15 }
 0x1a6   :  { %1618 = vst.msk [vmem:[%s3732_s3 + $0x1b8] sm:$0xff] %vm89_vm0, %v1554_v3  ;;  %v1233_v61 = vsub.f32 2.0, %v1169_v22  ;;  %v853_v36 = vmul.f32 1.442695, %v728_v54  ;;  %v3534_v17 = vadd.f32 %v3044_v63, %v3804_v32  ;;  %vm1492_vm5 = vcmp.gt.f32.partialorder %v3385_v13, 20.0 }
 0x1a7   :  { %v2087_v59 = vpop.eup %2086  ;;  %v1521_v25 = vsel %vm1457_vm2, %v3324_v11, %v1393_v48  ;;  %v3542_v45 = vadd.f32 2.0, %v3525_v50  ;;  %v1364_v44 = vmul.f32 %v3466_v28, %v3385_v13  ;;  %v3551_v11 = vmul.f32 %v2085_v39, %v885_v34 }
 0x1a8   :  { %v2089_v51 = vpop.eup %2088  ;;  %v1297_v46 = vmul.f32 %v2083_v23, %v1233_v61  ;;  %v1140_v57 = vmul.f32 %v2087_v59, %v3470_v4  ;;  %1585 = vst.msk [vmem:[%s3732_s3 + $0xb0] sm:$0xff] %vm89_vm0, %v1521_v25  ;;  %2100 = vpow2.f32 %v853_v36  ;;  %vm1459_vm6 = vcmp.gt.f32.partialorder %v3393_v10, 20.0  ;;  %v3806_v23 = vld [vmem:[#allocation2_spill] sm:$0xff] }
 0x1a9   :  { %v2091_v16 = vpop.eup %2090  ;;  %v1172_v26 = vmul.f32 %v2089_v51, %v3474_v31  ;;  %2102 = vrcp.f32 %v3542_v45  ;;  %v1331_v31 = vmul.f32 %v3476_v60, %v3393_v10  ;;  %v3559_v5 = vadd.f32 2.0, %v3551_v11 }
 0x1aa   :  { %v2093_v4 = vpop.eup %2092  ;;  %v1425_v8 = vmul.f32 %v1361_v40, %v1297_v46  ;;  %v1204_v12 = vsub.f32 2.0, %v1140_v57  ;;  %v917_v20 = vadd.f32 2.0, %v2091_v16  ;;  %v695_v56 = vmin.f32 %v3534_v17, 20.0 }
 0x1ab   :  { %v1236_v2 = vsub.f32 2.0, %v1172_v26  ;;  %v1139_v19 = vmul.f32 %v2093_v4, %v3486_v0  ;;  %v2095_v38 = vpop.eup %2094  ;;  %vm1491_vm7 = vcmp.gt.f32.partialorder %v3401_v1, 20.0  ;;  %2104 = vrcp.f32 %v3559_v5 }
 0x1ac   :  { %v1553_v28 = vsel %vm1489_vm3, %v3363_v15, %v1425_v8  ;;  %v1268_v21 = vmul.f32 %v2087_v59, %v1204_v12  ;;  %v3564_v52 = vmul.f32 %v2091_v16, %v917_v20  ;;  %v3575_v15 = vadd.f32 %v3044_v63, %v3805_v9  ;;  %v2097_v24 = vpop.eup %2096  ;;  %v3807_v12 = vld [vmem:[#allocation9_spill] sm:$0xff] }
 0x1ad   :  { %1617 = vst.msk [vmem:[%s3732_s3 + $0x1b0] sm:$0xff] %vm89_vm0, %v1553_v28  ;;  %v1300_v0 = vmul.f32 %v2089_v51, %v1236_v2  ;;  %v1203_v60 = vsub.f32 2.0, %v1139_v19  ;;  %v1171_v43 = vmul.f32 %v2095_v38, %v3500_v37  ;;  %v3581_v29 = vadd.f32 %v3044_v63, %v3806_v23 }
 0x1ae   :  { %v1396_v41 = vmul.f32 %v1332_v33, %v1268_v21  ;;  %v1045_v55 = vadd.f32 2.0, %v3564_v52  ;;  %v2099_v7 = vpop.eup %2098  ;;  %v888_v30 = vadd.f32 2.0, %v2097_v24  ;;  %v787_v39 = vmul.f32 1.442695, %v695_v56 }
 0x1af   :  { %v1428_v18 = vmul.f32 %v1364_v44, %v1300_v0  ;;  %v1267_v22 = vmul.f32 %v2093_v4, %v1203_v60  ;;  %v1235_v54 = vsub.f32 2.0, %v1171_v43  ;;  %v1142_v48 = vmul.f32 %v2099_v7, %v3513_v14 }
 0x1b0   :  { %v1524_v3 = vsel %vm1460_vm4, %v3381_v49, %v1396_v41  ;;  %2106 = vrcp.f32 %v1045_v55  ;;  %v3594_v61 = vmul.f32 %v2097_v24, %v888_v30  ;;  %v1363_v14 = vmul.f32 %v3492_v62, %v3401_v1 }
 0x1b1   :  { %1588 = vst.msk [vmem:[%s3732_s3 + $0xc8] sm:$0xff] %vm89_vm0, %v1524_v3  ;;  %v1556_v63 = vsel %vm1492_vm5, %v3385_v13, %v1428_v18  ;;  %v1395_v37 = vmul.f32 %v1331_v31, %v1267_v22  ;;  %2108 = vpow2.f32 %v787_v39  ;;  %v1299_v49 = vmul.f32 %v2095_v38, %v1235_v54 }
 0x1b2   :  { %1620 = vst.msk [vmem:[%s3732_s3 + $0x1c8] sm:$0xff] %vm89_vm0, %v1556_v63  ;;  %v1206_v34 = vsub.f32 2.0, %v1142_v48  ;;  %v727_v59 = vmin.f32 %v3575_v15, 20.0  ;;  %v2101_v40 = vpop.eup %2100  ;;  %v1334_v33 = vmul.f32 %v3502_v53, %v3405_v58  ;;  %v1016_v36 = vadd.f32 2.0, %v3594_v61 }
 0x1b3   :  { %v1523_v13 = vsel %vm1459_vm6, %v3393_v10, %v1395_v37  ;;  %v698_v32 = vmin.f32 %v3581_v29, 20.0  ;;  %v2103_v51 = vpop.eup %2102  ;;  %v1427_v62 = vmul.f32 %v1363_v14, %v1299_v49  ;;  %v920_v46 = vadd.f32 2.0, %v2101_v40 }
 0x1b4   :  { %1587 = vst.msk [vmem:[%s3732_s3 + $0xc0] sm:$0xff] %vm89_vm0, %v1523_v13  ;;  %v1270_v25 = vmul.f32 %v2099_v7, %v1206_v34  ;;  %v851_v57 = vmul.f32 1.442695, %v727_v59  ;;  %vm1462_vm8 = vcmp.gt.f32.partialorder %v3405_v58, 20.0  ;;  %v1174_v10 = vmul.f32 %v2103_v51, %v3542_v45  ;;  %v2137_v45 = vld [vmem:[%s3731_s2] ss:$0 sm:$0xff] }
 0x1b5   :  { %2110 = vrcp.f32 %v1016_v36  ;;  %v793_v53 = vmul.f32 1.442695, %v698_v32  ;;  %v1555_v16 = vsel %vm1491_vm7, %v3401_v1, %v1427_v62  ;;  %v3619_v44 = vmul.f32 %v2101_v40, %v920_v46  ;;  %v2105_v4 = vpop.eup %2104  ;;  %v3808_v1 = vld [vmem:[#allocation3_spill] sm:$0xff] }
 0x1b6   :  { %v1398_v26 = vmul.f32 %v1334_v33, %v1270_v25  ;;  %2112 = vpow2.f32 %v851_v57  ;;  %1619 = vst.msk [vmem:[%s3732_s3 + $0x1c0] sm:$0xff] %vm89_vm0, %v1555_v16  ;;  %v1238_v8 = vsub.f32 2.0, %v1174_v10  ;;  %v3629_v20 = vadd.f32 %v2137_v45, %v3807_v12 }
 0x1b7   :  { %2114 = vpow2.f32 %v793_v53  ;;  %v3632_v2 = vadd.f32 %v2137_v45, %v3808_v1  ;;  %v1141_v31 = vmul.f32 %v2105_v4, %v3559_v5  ;;  %v1048_v28 = vadd.f32 2.0, %v3619_v44  ;;  %v3809_v5 = vld [vmem:[#allocation10_spill] sm:$0xff] }
 0x1b8   :  { %v1526_v19 = vsel %vm1462_vm8, %v3405_v58, %v1398_v26  ;;  %v1302_v21 = vmul.f32 %v2103_v51, %v1238_v8  ;;  %v1366_v56 = vmul.f32 %v3525_v50, %v3430_v27  ;;  %v730_v38 = vmin.f32 %v3629_v20, 20.0 }
 0x1b9   :  { %1590 = vst.msk [vmem:[%s3732_s3 + $0xd8] sm:$0xff] %vm89_vm0, %v1526_v19  ;;  %v697_v0 = vmin.f32 %v3632_v2, 20.0  ;;  %vm1494_vm9 = vcmp.gt.f32.partialorder %v3430_v27, 20.0  ;;  %v1205_v58 = vsub.f32 2.0, %v1141_v31  ;;  %2116 = vrcp.f32 %v1048_v28 }
 0x1ba   :  { %v2107_v60 = vpop.eup %2106  ;;  %v3647_v9 = vadd.f32 %v2137_v45, %v3809_v5  ;;  %v1430_v41 = vmul.f32 %v1366_v56, %v1302_v21  ;;  %v857_v23 = vmul.f32 1.442695, %v730_v38  ;;  %v1333_v50 = vmul.f32 %v3551_v11, %v3434_v6 }
 0x1bb   :  { %v2109_v24 = vpop.eup %2108  ;;  %v1173_v43 = vmul.f32 %v2107_v60, %v1045_v55  ;;  %v791_v7 = vmul.f32 1.442695, %v697_v0  ;;  %v1269_v18 = vmul.f32 %v2105_v4, %v1205_v58  ;;  %vm1461_vm10 = vcmp.gt.f32.partialorder %v3434_v6, 20.0 }
 0x1bc   :  { %v887_v22 = vadd.f32 2.0, %v2109_v24  ;;  %v729_v30 = vmin.f32 %v3647_v9, 20.0  ;;  %v1558_v39 = vsel %vm1494_vm9, %v3430_v27, %v1430_v41  ;;  %2118 = vpow2.f32 %v857_v23 }
 0x1bd   :  { %v1237_v3 = vsub.f32 2.0, %v1173_v43  ;;  %1622 = vst.msk [vmem:[%s3732_s3 + $0x1d8] sm:$0xff] %vm89_vm0, %v1558_v39  ;;  %v1397_v54 = vmul.f32 %v1333_v50, %v1269_v18  ;;  %2120 = vpow2.f32 %v791_v7  ;;  %v1365_v37 = vmul.f32 %v3564_v52, %v3462_v42 }
 0x1be   :  { %v951_v55 = vmul.f32 %v2109_v24, %v887_v22  ;;  %v855_v48 = vmul.f32 1.442695, %v729_v30  ;;  %vm1493_vm11 = vcmp.gt.f32.partialorder %v3462_v42, 20.0  ;;  %v1336_v62 = vmul.f32 %v3594_v61, %v3480_v47 }
 0x1bf   :  { %v2111_v63 = vpop.eup %2110  ;;  %v1301_v11 = vmul.f32 %v2107_v60, %v1237_v3  ;;  %v1525_v27 = vsel %vm1461_vm10, %v3434_v6, %v1397_v54  ;;  %vm1464_vm12 = vcmp.gt.f32.partialorder %v3480_v47, 20.0  ;;  %v1368_v45 = vmul.f32 %v3619_v44, %v3507_v35 }
 0x1c0   :  { %v2113_v49 = vpop.eup %2112  ;;  %v1144_v14 = vmul.f32 %v2111_v63, %v1016_v36  ;;  %v1015_v34 = vadd.f32 2.0, %v951_v55  ;;  %1589 = vst.msk [vmem:[%s3732_s3 + $0xd0] sm:$0xff] %vm89_vm0, %v1525_v27  ;;  %2122 = vpow2.f32 %v855_v48  ;;  %vm1496_vm13 = vcmp.gt.f32.partialorder %v3507_v35, 20.0 }
 0x1c1   :  { %v2115_v59 = vpop.eup %2114  ;;  %v1429_v40 = vmul.f32 %v1365_v37, %v1301_v11  ;;  %v919_v13 = vadd.f32 2.0, %v2113_v49  ;;  %v1335_v43 = vmul.f32 %v951_v55, %v3534_v17  ;;  %vm1463_vm14 = vcmp.gt.f32.partialorder %v3534_v17, 20.0 }
 0x1c2   :  { %v1208_v33 = vsub.f32 2.0, %v1144_v14  ;;  %2124 = vrcp.f32 %v1015_v34  ;;  %v890_v32 = vadd.f32 2.0, %v2115_v59  ;;  %vm1495_vm15 = vcmp.gt.f32.partialorder %v3575_v15, 20.0 }
 0x1c3   :  { %v1557_v52 = vsel %vm1493_vm11, %v3462_v42, %v1429_v40  ;;  %v983_v51 = vmul.f32 %v2113_v49, %v919_v13  ;;  %v2117_v6 = vpop.eup %2116  ;;  %vm1466_vm1 = vcmp.gt.f32.partialorder %v3581_v29, 20.0  ;;  %vm1498_vm2 = vcmp.gt.f32.partialorder %v3629_v20, 20.0 }
 0x1c4   :  { %1621 = vst.msk [vmem:[%s3732_s3 + $0x1d0] sm:$0xff] %vm89_vm0, %v1557_v52  ;;  %v1272_v36 = vmul.f32 %v2111_v63, %v1208_v33  ;;  %v954_v25 = vmul.f32 %v2115_v59, %v890_v32  ;;  %v1176_v46 = vmul.f32 %v2117_v6, %v1048_v28  ;;  %vm1465_vm3 = vcmp.gt.f32.partialorder %v3632_v2, 20.0 }
 0x1c5   :  { %v1047_v57 = vadd.f32 2.0, %v983_v51  ;;  %v1367_v3 = vmul.f32 %v983_v51, %v3575_v15  ;;  %vm1497_vm4 = vcmp.gt.f32.partialorder %v3647_v9, 20.0 }
 0x1c6   :  { %v1400_v10 = vmul.f32 %v1336_v62, %v1272_v36  ;;  %v1018_v53 = vadd.f32 2.0, %v954_v25  ;;  %v2119_v16 = vpop.eup %2118  ;;  %v1240_v42 = vsub.f32 2.0, %v1176_v46  ;;  %v1338_v55 = vmul.f32 %v954_v25, %v3581_v29 }
 0x1c7   :  { %2126 = vrcp.f32 %v1047_v57  ;;  %v2121_v26 = vpop.eup %2120  ;;  %v922_v8 = vadd.f32 2.0, %v2119_v16 }
 0x1c8   :  { %v1528_v4 = vsel %vm1464_vm12, %v3480_v47, %v1400_v10  ;;  %2128 = vrcp.f32 %v1018_v53  ;;  %v1304_v61 = vmul.f32 %v2117_v6, %v1240_v42  ;;  %v889_v12 = vadd.f32 2.0, %v2121_v26 }
 0x1c9   :  { %1592 = vst.msk [vmem:[%s3732_s3 + $0xe8] sm:$0xff] %vm89_vm0, %v1528_v4  ;;  %v986_v1 = vmul.f32 %v2119_v16, %v922_v8 }
 0x1ca   :  { %v2123_v19 = vpop.eup %2122  ;;  %v1432_v31 = vmul.f32 %v1368_v45, %v1304_v61  ;;  %v953_v28 = vmul.f32 %v2121_v26, %v889_v12 }
 0x1cb   :  { %v1050_v47 = vadd.f32 2.0, %v986_v1  ;;  %v921_v56 = vadd.f32 2.0, %v2123_v19 }
 0x1cc   :  { %v2125_v21 = vpop.eup %2124  ;;  %v1560_v38 = vsel %vm1496_vm13, %v3507_v35, %v1432_v31  ;;  %v1017_v60 = vadd.f32 2.0, %v953_v28  ;;  %v1337_v52 = vmul.f32 %v953_v28, %v3632_v2 }
 0x1cd   :  { %v1143_v0 = vmul.f32 %v2125_v21, %v1015_v34  ;;  %1624 = vst.msk [vmem:[%s3732_s3 + $0x1e8] sm:$0xff] %vm89_vm0, %v1560_v38  ;;  %2130 = vrcp.f32 %v1050_v47  ;;  %v985_v44 = vmul.f32 %v2123_v19, %v921_v56 }
 0x1ce   :  { %2132 = vrcp.f32 %v1017_v60 }
 0x1cf   :  { %v1207_v58 = vsub.f32 2.0, %v1143_v0  ;;  %v1049_v5 = vadd.f32 2.0, %v985_v44  ;;  %v1369_v25 = vmul.f32 %v985_v44, %v3647_v9 }
 0x1d1   :  { %v2127_v24 = vpop.eup %2126  ;;  %v1271_v41 = vmul.f32 %v2125_v21, %v1207_v58  ;;  %2134 = vrcp.f32 %v1049_v5 }
 0x1d2   :  { %v2129_v23 = vpop.eup %2128  ;;  %v1175_v7 = vmul.f32 %v2127_v24, %v1047_v57 }
 0x1d3   :  { %v1399_v35 = vmul.f32 %v1335_v43, %v1271_v41  ;;  %v1146_v18 = vmul.f32 %v2129_v23, %v1018_v53 }
 0x1d4   :  { %v1239_v50 = vsub.f32 2.0, %v1175_v7 }
 0x1d5   :  { %v1527_v22 = vsel %vm1463_vm14, %v3534_v17, %v1399_v35  ;;  %v1210_v30 = vsub.f32 2.0, %v1146_v18 }
 0x1d6   :  { %1591 = vst.msk [vmem:[%s3732_s3 + $0xe0] sm:$0xff] %vm89_vm0, %v1527_v22  ;;  %v1303_v39 = vmul.f32 %v2127_v24, %v1239_v50 }
 0x1d7   :  { %v1274_v54 = vmul.f32 %v2129_v23, %v1210_v30  ;;  %v2131_v48 = vpop.eup %2130 }
 0x1d8   :  { %v1431_v63 = vmul.f32 %v1367_v3, %v1303_v39  ;;  %v2133_v11 = vpop.eup %2132  ;;  %v1178_v49 = vmul.f32 %v2131_v48, %v1050_v47 }
 0x1d9   :  { %v1402_v37 = vmul.f32 %v1338_v55, %v1274_v54  ;;  %v1145_v27 = vmul.f32 %v2133_v11, %v1017_v60 }
 0x1da   :  { %v1559_v17 = vsel %vm1495_vm15, %v3575_v15, %v1431_v63  ;;  %v1242_v34 = vsub.f32 2.0, %v1178_v49  ;;  %v1370_v15 = vmul.f32 %v986_v1, %v3629_v20 }
 0x1db   :  { %1623 = vst.msk [vmem:[%s3732_s3 + $0x1e0] sm:$0xff] %vm89_vm0, %v1559_v17  ;;  %v1530_v14 = vsel %vm1466_vm1, %v3581_v29, %v1402_v37  ;;  %v2135_v59 = vpop.eup %2134  ;;  %v1209_v40 = vsub.f32 2.0, %v1145_v27 }
 0x1dc   :  { %1594 = vst.msk [vmem:[%s3732_s3 + $0xf8] sm:$0xff] %vm89_vm0, %v1530_v14  ;;  %v1306_v13 = vmul.f32 %v2131_v48, %v1242_v34  ;;  %v1177_v33 = vmul.f32 %v2135_v59, %v1049_v5 }
 0x1dd   :  { %v1273_v32 = vmul.f32 %v2133_v11, %v1209_v40 }
 0x1de   :  { %v1434_v51 = vmul.f32 %v1370_v15, %v1306_v13  ;;  %v1241_v6 = vsub.f32 2.0, %v1177_v33 }
 0x1df   :  { %v1401_v29 = vmul.f32 %v1337_v52, %v1273_v32 }
 0x1e0   :  { %v1562_v36 = vsel %vm1498_vm2, %v3629_v20, %v1434_v51  ;;  %v1305_v62 = vmul.f32 %v2135_v59, %v1241_v6 }
 0x1e1   :  { %1626 = vst.msk [vmem:[%s3732_s3 + $0x1f8] sm:$0xff] %vm89_vm0, %v1562_v36  ;;  %v1529_v46 = vsel %vm1465_vm3, %v3632_v2, %v1401_v29 }
 0x1e2   :  { %1593 = vst.msk [vmem:[%s3732_s3 + $0xf0] sm:$0xff] %vm89_vm0, %v1529_v46  ;;  %v1433_v57 = vmul.f32 %v1369_v25, %v1305_v62 }
 0x1e4   :  { %v1561_v20 = vsel %vm1497_vm4, %v3647_v9, %v1433_v57 }
 0x1e5   :  { %1625 = vst.msk [vmem:[%s3732_s3 + $0x1f0] sm:$0xff] %vm89_vm0, %v1561_v20 }

</bundles_post_ra>
